<compile_context>
chip_gen: v6e
topology: v6e:2x2x1
jax: 0.10.0
libtpu: 0.0.40
codegen_flags: <defaults>
</compile_context>

<pallas_src>
import jax
import jax.numpy as jnp
from jax import lax
from jax.experimental import pallas as pl
from jax.experimental.pallas import tpu as pltpu


def _basic_conv_kernel(x_ref, w_ref, scale_ref, shift_ref, o_ref):
    # x_ref:     (1, H+2p, W+2p, Cin_p)  padded input tile for this batch elem
    # w_ref:     (KH, KW, Cin_p, TC)     conv weights (HWIO), one Cout tile
    # scale_ref: (1, TC)                 folded BN scale = gamma / sqrt(var+eps)
    # shift_ref: (1, TC)                 folded BN shift = beta - mean * scale
    # o_ref:     (1, H, W, TC)
    KH, KW = w_ref.shape[0], w_ref.shape[1]
    H, W = o_ref.shape[1], o_ref.shape[2]
    Cin = x_ref.shape[3]

    acc = None
    # kw shift (unaligned sublane slice) hoisted to the outer loop: only KW
    # shifted slabs total, each reused across the KH taps via outer-dim slices
    # (no relayout).  Static python loops -> 9 unrolled MXU calls.
    for kw in range(KW):
        slab = x_ref[0, :, kw:kw + W, :]                  # (Hp, W, Cin_p)
        for kh in range(KH):
            patch = slab[kh:kh + H].reshape(H * W, Cin)   # collapse (H,W)->M
            contrib = jnp.dot(patch, w_ref[kh, kw],
                              preferred_element_type=jnp.float32)
            acc = contrib if acc is None else acc + contrib

    y = acc * scale_ref[...] + shift_ref[...]             # BatchNorm (eval)
    y = jnp.maximum(y, 0.0)                               # ReLU
    o_ref[0] = y.reshape(H, W, -1).astype(o_ref.dtype)    # single store


def _round_up(v, m):
    return ((v + m - 1) // m) * m


def basic_conv(x_nchw, weight_oihw, gamma, beta, running_mean, running_var,
               *, padding=1, eps=1e-5, compute_dtype=jnp.float32,
               cout_tile=128):
    """BasicConv forward: Conv2d(k=3, s=1, p=1, bias=False) + BN(eval) + ReLU."""
    N, Cin, H, W = x_nchw.shape
    Cout, Cin_w, KH, KW = weight_oihw.shape
    assert Cin == Cin_w
    # TODO(synk): only the 'same'-padding, stride=1, dilation=1, groups=1,
    # bias=False configuration is supported by this kernel.

    Cin_p = _round_up(Cin, 128)    # lane-dense contraction dim
    Cout_p = _round_up(Cout, 128)  # lane-dense output dim (unmasked stores)
    tc = min(cout_tile, Cout_p)
    assert Cout_p % tc == 0

    p = padding
    Hp, Wp = H + 2 * p, W + 2 * p

    # NCHW -> NHWC; one jnp.pad pass does both the spatial halo and the
    # channel (lane) padding.
    x = jnp.transpose(x_nchw, (0, 2, 3, 1)).astype(compute_dtype)
    x_pad = jnp.pad(x, ((0, 0), (p, p), (p, p), (0, Cin_p - Cin)))

    # OIHW -> HWIO, zero-padded channels (zero Cin taps contribute nothing,
    # extra Cout channels are sliced off after the kernel).
    w = jnp.transpose(weight_oihw, (2, 3, 1, 0)).astype(compute_dtype)
    w = jnp.pad(w, ((0, 0), (0, 0), (0, Cin_p - Cin), (0, Cout_p - Cout)))

    # Fold BN (inference semantics) into per-channel scale/shift.
    scale = (gamma / jnp.sqrt(running_var + eps)).astype(jnp.float32)
    shift = (beta - running_mean * scale).astype(jnp.float32)
    scale = jnp.pad(scale, (0, Cout_p - Cout)).reshape(1, Cout_p)
    shift = jnp.pad(shift, (0, Cout_p - Cout)).reshape(1, Cout_p)

    grid = (N, Cout_p // tc)   # both parallel -> shards across v7x's 2 TCs

    out_nhwc = pl.pallas_call(
        _basic_conv_kernel,
        out_shape=jax.ShapeDtypeStruct((N, H, W, Cout_p), jnp.float32),
        grid_spec=pltpu.PrefetchScalarGridSpec(
            num_scalar_prefetch=0,
            grid=grid,
            in_specs=[
                pl.BlockSpec((1, Hp, Wp, Cin_p), lambda n, c: (n, 0, 0, 0)),
                pl.BlockSpec((KH, KW, Cin_p, tc), lambda n, c: (0, 0, 0, c)),
                pl.BlockSpec((1, tc), lambda n, c: (0, c)),
                pl.BlockSpec((1, tc), lambda n, c: (0, c)),
            ],
            out_specs=pl.BlockSpec((1, H, W, tc), lambda n, c: (n, 0, 0, c)),
        ),
        compiler_params=pltpu.CompilerParams(
            dimension_semantics=("parallel", "parallel"),
            vmem_limit_bytes=32 * 1024 * 1024),
    )(x_pad, w, scale, shift)

    # Drop channel padding, NHWC -> NCHW to match PyTorch output convention.
    return jnp.transpose(out_nhwc[..., :Cout], (0, 3, 1, 2))


def _reference(x_nchw, weight_oihw, gamma, beta, running_mean, running_var,
               *, padding=1, eps=1e-5):
    """Plain-JAX fp32 reference (same semantics) for a correctness check."""
    x = jnp.transpose(x_nchw, (0, 2, 3, 1))
    w = jnp.transpose(weight_oihw, (2, 3, 1, 0))
    y = lax.conv_general_dilated(
        x, w, window_strides=(1, 1),
        padding=[(padding, padding), (padding, padding)],
        dimension_numbers=("NHWC", "HWIO", "NHWC"))
    scale = gamma / jnp.sqrt(running_var + eps)
    shift = beta - running_mean * scale
    y = y * scale + shift
    y = jnp.maximum(y, 0.0)
    return jnp.transpose(y, (0, 3, 1, 2))


if __name__ == "__main__":
    key = jax.random.PRNGKey(0)
    k_x, k_w, k_g, k_b, k_m, k_v = jax.random.split(key, 6)

    N, Cin, H, W = 2, 4, 16, 16
    Cout, K = 8, 3

    x = jax.random.normal(k_x, (N, Cin, H, W), dtype=jnp.float32)
    weight = jax.random.normal(k_w, (Cout, Cin, K, K), dtype=jnp.float32) * 0.1
    gamma = 1.0 + 0.1 * jax.random.normal(k_g, (Cout,), dtype=jnp.float32)
    beta = 0.1 * jax.random.normal(k_b, (Cout,), dtype=jnp.float32)
    running_mean = 0.1 * jax.random.normal(k_m, (Cout,), dtype=jnp.float32)
    running_var = jnp.abs(1.0 + 0.1 * jax.random.normal(k_v, (Cout,),
                                                        dtype=jnp.float32))

    ref = _reference(x, weight, gamma, beta, running_mean, running_var)

    # fp32 operands: exact-ish match against the fp32 reference.
    out_f32 = basic_conv(x, weight, gamma, beta, running_mean, running_var,
                         compute_dtype=jnp.float32)
    out_f32 = jax.block_until_ready(out_f32)
    assert out_f32.shape == (N, Cout, H, W)
    assert jnp.allclose(out_f32, ref, atol=1e-4, rtol=1e-4)

    # bf16 operands (f32 accumulation): MXU-friendly path, looser tolerance.
    out_bf16 = basic_conv(x, weight, gamma, beta, running_mean, running_var,
                          compute_dtype=jnp.bfloat16)
    out_bf16 = jax.block_until_ready(out_bf16)
    assert out_bf16.shape == (N, Cout, H, W)
    assert jnp.allclose(out_bf16, ref, atol=1e-1, rtol=5e-2)

    print("KERNEL_OK")
</pallas_src>

<mosaic_0001>
module attributes {stable_mosaic.version = 11 : i64} {
  func.func @_basic_conv_kernel(%arg0: i32, %arg1: i32, %arg2: memref<1x18x18x128xf32, #tpu.memory_space<vmem>>, %arg3: memref<3x3x128x128xf32, #tpu.memory_space<vmem>>, %arg4: memref<1x128xf32, #tpu.memory_space<vmem>>, %arg5: memref<1x128xf32, #tpu.memory_space<vmem>>, %arg6: memref<1x16x16x128xf32, #tpu.memory_space<vmem>>) attributes {dimension_semantics = [#tpu.dimension_semantics<parallel>, #tpu.dimension_semantics<parallel>], iteration_bounds = array<i64: 2, 1>, scalar_prefetch = 0 : i64, scratch_operands = 0 : i64, tpu.core_type = #tpu.core_type<tc>, window_params = [{transform_indices = @transform_0, window_bounds = array<i64: 1, 18, 18, 128>}, {transform_indices = @transform_1, window_bounds = array<i64: 3, 3, 128, 128>}, {transform_indices = @transform_2, window_bounds = array<i64: 1, 128>}, {transform_indices = @transform_3, window_bounds = array<i64: 1, 128>}, {transform_indices = @transform_4, window_bounds = array<i64: 1, 16, 16, 128>}]} {
    %c0 = arith.constant 0 : index
    %c0_0 = arith.constant 0 : index
    %c0_1 = arith.constant 0 : index
    %c0_2 = arith.constant 0 : index
    %0 = vector.load %arg2[%c0, %c0_0, %c0_1, %c0_2] : memref<1x18x18x128xf32, #tpu.memory_space<vmem>>, vector<1x18x16x128xf32>
    %1 = vector.shape_cast %0 : vector<1x18x16x128xf32> to vector<18x16x128xf32>
    %2 = vector.extract_strided_slice %1 {offsets = [0, 0, 0], sizes = [16, 16, 128], strides = [1, 1, 1]} : vector<18x16x128xf32> to vector<16x16x128xf32>
    %3 = vector.shape_cast %2 : vector<16x16x128xf32> to vector<256x128xf32>
    %c0_3 = arith.constant 0 : index
    %c0_4 = arith.constant 0 : index
    %c0_5 = arith.constant 0 : index
    %c0_6 = arith.constant 0 : index
    %4 = vector.load %arg3[%c0_3, %c0_4, %c0_5, %c0_6] : memref<3x3x128x128xf32, #tpu.memory_space<vmem>>, vector<1x1x128x128xf32>
    %5 = vector.shape_cast %4 : vector<1x1x128x128xf32> to vector<128x128xf32>
    %cst = arith.constant dense<0.000000e+00> : vector<256x128xf32>
    %6 = tpu.matmul %3, %5, %cst {dimension_numbers = #tpu.dot_dimension_numbers<[1], [0], [0], [1], [0, 0, 1, 1], [], []>} : vector<256x128xf32>, vector<128x128xf32>, vector<256x128xf32> -> vector<256x128xf32>
    %7 = vector.extract_strided_slice %1 {offsets = [1, 0, 0], sizes = [16, 16, 128], strides = [1, 1, 1]} : vector<18x16x128xf32> to vector<16x16x128xf32>
    %8 = vector.shape_cast %7 : vector<16x16x128xf32> to vector<256x128xf32>
    %c1 = arith.constant 1 : index
    %c0_7 = arith.constant 0 : index
    %c0_8 = arith.constant 0 : index
    %c0_9 = arith.constant 0 : index
    %9 = vector.load %arg3[%c1, %c0_7, %c0_8, %c0_9] : memref<3x3x128x128xf32, #tpu.memory_space<vmem>>, vector<1x1x128x128xf32>
    %10 = vector.shape_cast %9 : vector<1x1x128x128xf32> to vector<128x128xf32>
    %cst_10 = arith.constant dense<0.000000e+00> : vector<256x128xf32>
    %11 = tpu.matmul %8, %10, %cst_10 {dimension_numbers = #tpu.dot_dimension_numbers<[1], [0], [0], [1], [0, 0, 1, 1], [], []>} : vector<256x128xf32>, vector<128x128xf32>, vector<256x128xf32> -> vector<256x128xf32>
    %12 = arith.addf %6, %11 : vector<256x128xf32>
    %13 = vector.extract_strided_slice %1 {offsets = [2, 0, 0], sizes = [16, 16, 128], strides = [1, 1, 1]} : vector<18x16x128xf32> to vector<16x16x128xf32>
    %14 = vector.shape_cast %13 : vector<16x16x128xf32> to vector<256x128xf32>
    %c2 = arith.constant 2 : index
    %c0_11 = arith.constant 0 : index
    %c0_12 = arith.constant 0 : index
    %c0_13 = arith.constant 0 : index
    %15 = vector.load %arg3[%c2, %c0_11, %c0_12, %c0_13] : memref<3x3x128x128xf32, #tpu.memory_space<vmem>>, vector<1x1x128x128xf32>
    %16 = vector.shape_cast %15 : vector<1x1x128x128xf32> to vector<128x128xf32>
    %cst_14 = arith.constant dense<0.000000e+00> : vector<256x128xf32>
    %17 = tpu.matmul %14, %16, %cst_14 {dimension_numbers = #tpu.dot_dimension_numbers<[1], [0], [0], [1], [0, 0, 1, 1], [], []>} : vector<256x128xf32>, vector<128x128xf32>, vector<256x128xf32> -> vector<256x128xf32>
    %18 = arith.addf %12, %17 : vector<256x128xf32>
    %c0_15 = arith.constant 0 : index
    %c0_16 = arith.constant 0 : index
    %c1_17 = arith.constant 1 : index
    %c0_18 = arith.constant 0 : index
    %19 = vector.load %arg2[%c0_15, %c0_16, %c1_17, %c0_18] : memref<1x18x18x128xf32, #tpu.memory_space<vmem>>, vector<1x18x16x128xf32>
    %20 = vector.shape_cast %19 : vector<1x18x16x128xf32> to vector<18x16x128xf32>
    %21 = vector.extract_strided_slice %20 {offsets = [0, 0, 0], sizes = [16, 16, 128], strides = [1, 1, 1]} : vector<18x16x128xf32> to vector<16x16x128xf32>
    %22 = vector.shape_cast %21 : vector<16x16x128xf32> to vector<256x128xf32>
    %c0_19 = arith.constant 0 : index
    %c1_20 = arith.constant 1 : index
    %c0_21 = arith.constant 0 : index
    %c0_22 = arith.constant 0 : index
    %23 = vector.load %arg3[%c0_19, %c1_20, %c0_21, %c0_22] : memref<3x3x128x128xf32, #tpu.memory_space<vmem>>, vector<1x1x128x128xf32>
    %24 = vector.shape_cast %23 : vector<1x1x128x128xf32> to vector<128x128xf32>
    %cst_23 = arith.constant dense<0.000000e+00> : vector<256x128xf32>
    %25 = tpu.matmul %22, %24, %cst_23 {dimension_numbers = #tpu.dot_dimension_numbers<[1], [0], [0], [1], [0, 0, 1, 1], [], []>} : vector<256x128xf32>, vector<128x128xf32>, vector<256x128xf32> -> vector<256x128xf32>
    %26 = arith.addf %18, %25 : vector<256x128xf32>
    %27 = vector.extract_strided_slice %20 {offsets = [1, 0, 0], sizes = [16, 16, 128], strides = [1, 1, 1]} : vector<18x16x128xf32> to vector<16x16x128xf32>
    %28 = vector.shape_cast %27 : vector<16x16x128xf32> to vector<256x128xf32>
    %c1_24 = arith.constant 1 : index
    %c1_25 = arith.constant 1 : index
    %c0_26 = arith.constant 0 : index
    %c0_27 = arith.constant 0 : index
    %29 = vector.load %arg3[%c1_24, %c1_25, %c0_26, %c0_27] : memref<3x3x128x128xf32, #tpu.memory_space<vmem>>, vector<1x1x128x128xf32>
    %30 = vector.shape_cast %29 : vector<1x1x128x128xf32> to vector<128x128xf32>
    %cst_28 = arith.constant dense<0.000000e+00> : vector<256x128xf32>
    %31 = tpu.matmul %28, %30, %cst_28 {dimension_numbers = #tpu.dot_dimension_numbers<[1], [0], [0], [1], [0, 0, 1, 1], [], []>} : vector<256x128xf32>, vector<128x128xf32>, vector<256x128xf32> -> vector<256x128xf32>
    %32 = arith.addf %26, %31 : vector<256x128xf32>
    %33 = vector.extract_strided_slice %20 {offsets = [2, 0, 0], sizes = [16, 16, 128], strides = [1, 1, 1]} : vector<18x16x128xf32> to vector<16x16x128xf32>
    %34 = vector.shape_cast %33 : vector<16x16x128xf32> to vector<256x128xf32>
    %c2_29 = arith.constant 2 : index
    %c1_30 = arith.constant 1 : index
    %c0_31 = arith.constant 0 : index
    %c0_32 = arith.constant 0 : index
    %35 = vector.load %arg3[%c2_29, %c1_30, %c0_31, %c0_32] : memref<3x3x128x128xf32, #tpu.memory_space<vmem>>, vector<1x1x128x128xf32>
    %36 = vector.shape_cast %35 : vector<1x1x128x128xf32> to vector<128x128xf32>
    %cst_33 = arith.constant dense<0.000000e+00> : vector<256x128xf32>
    %37 = tpu.matmul %34, %36, %cst_33 {dimension_numbers = #tpu.dot_dimension_numbers<[1], [0], [0], [1], [0, 0, 1, 1], [], []>} : vector<256x128xf32>, vector<128x128xf32>, vector<256x128xf32> -> vector<256x128xf32>
    %38 = arith.addf %32, %37 : vector<256x128xf32>
    %c0_34 = arith.constant 0 : index
    %c0_35 = arith.constant 0 : index
    %c2_36 = arith.constant 2 : index
    %c0_37 = arith.constant 0 : index
    %39 = vector.load %arg2[%c0_34, %c0_35, %c2_36, %c0_37] : memref<1x18x18x128xf32, #tpu.memory_space<vmem>>, vector<1x18x16x128xf32>
    %40 = vector.shape_cast %39 : vector<1x18x16x128xf32> to vector<18x16x128xf32>
    %41 = vector.extract_strided_slice %40 {offsets = [0, 0, 0], sizes = [16, 16, 128], strides = [1, 1, 1]} : vector<18x16x128xf32> to vector<16x16x128xf32>
    %42 = vector.shape_cast %41 : vector<16x16x128xf32> to vector<256x128xf32>
    %c0_38 = arith.constant 0 : index
    %c2_39 = arith.constant 2 : index
    %c0_40 = arith.constant 0 : index
    %c0_41 = arith.constant 0 : index
    %43 = vector.load %arg3[%c0_38, %c2_39, %c0_40, %c0_41] : memref<3x3x128x128xf32, #tpu.memory_space<vmem>>, vector<1x1x128x128xf32>
    %44 = vector.shape_cast %43 : vector<1x1x128x128xf32> to vector<128x128xf32>
    %cst_42 = arith.constant dense<0.000000e+00> : vector<256x128xf32>
    %45 = tpu.matmul %42, %44, %cst_42 {dimension_numbers = #tpu.dot_dimension_numbers<[1], [0], [0], [1], [0, 0, 1, 1], [], []>} : vector<256x128xf32>, vector<128x128xf32>, vector<256x128xf32> -> vector<256x128xf32>
    %46 = arith.addf %38, %45 : vector<256x128xf32>
    %47 = vector.extract_strided_slice %40 {offsets = [1, 0, 0], sizes = [16, 16, 128], strides = [1, 1, 1]} : vector<18x16x128xf32> to vector<16x16x128xf32>
    %48 = vector.shape_cast %47 : vector<16x16x128xf32> to vector<256x128xf32>
    %c1_43 = arith.constant 1 : index
    %c2_44 = arith.constant 2 : index
    %c0_45 = arith.constant 0 : index
    %c0_46 = arith.constant 0 : index
    %49 = vector.load %arg3[%c1_43, %c2_44, %c0_45, %c0_46] : memref<3x3x128x128xf32, #tpu.memory_space<vmem>>, vector<1x1x128x128xf32>
    %50 = vector.shape_cast %49 : vector<1x1x128x128xf32> to vector<128x128xf32>
    %cst_47 = arith.constant dense<0.000000e+00> : vector<256x128xf32>
    %51 = tpu.matmul %48, %50, %cst_47 {dimension_numbers = #tpu.dot_dimension_numbers<[1], [0], [0], [1], [0, 0, 1, 1], [], []>} : vector<256x128xf32>, vector<128x128xf32>, vector<256x128xf32> -> vector<256x128xf32>
    %52 = arith.addf %46, %51 : vector<256x128xf32>
    %53 = vector.extract_strided_slice %40 {offsets = [2, 0, 0], sizes = [16, 16, 128], strides = [1, 1, 1]} : vector<18x16x128xf32> to vector<16x16x128xf32>
    %54 = vector.shape_cast %53 : vector<16x16x128xf32> to vector<256x128xf32>
    %c2_48 = arith.constant 2 : index
    %c2_49 = arith.constant 2 : index
    %c0_50 = arith.constant 0 : index
    %c0_51 = arith.constant 0 : index
    %55 = vector.load %arg3[%c2_48, %c2_49, %c0_50, %c0_51] : memref<3x3x128x128xf32, #tpu.memory_space<vmem>>, vector<1x1x128x128xf32>
    %56 = vector.shape_cast %55 : vector<1x1x128x128xf32> to vector<128x128xf32>
    %cst_52 = arith.constant dense<0.000000e+00> : vector<256x128xf32>
    %57 = tpu.matmul %54, %56, %cst_52 {dimension_numbers = #tpu.dot_dimension_numbers<[1], [0], [0], [1], [0, 0, 1, 1], [], []>} : vector<256x128xf32>, vector<128x128xf32>, vector<256x128xf32> -> vector<256x128xf32>
    %58 = arith.addf %52, %57 : vector<256x128xf32>
    %c0_53 = arith.constant 0 : index
    %c0_54 = arith.constant 0 : index
    %59 = vector.load %arg4[%c0_53, %c0_54] : memref<1x128xf32, #tpu.memory_space<vmem>>, vector<1x128xf32>
    %60 = vector.broadcast %59 : vector<1x128xf32> to vector<256x128xf32>
    %61 = arith.mulf %58, %60 : vector<256x128xf32>
    %c0_55 = arith.constant 0 : index
    %c0_56 = arith.constant 0 : index
    %62 = vector.load %arg5[%c0_55, %c0_56] : memref<1x128xf32, #tpu.memory_space<vmem>>, vector<1x128xf32>
    %63 = vector.broadcast %62 : vector<1x128xf32> to vector<256x128xf32>
    %64 = arith.addf %61, %63 : vector<256x128xf32>
    %cst_57 = arith.constant 0.000000e+00 : f32
    %65 = vector.broadcast %cst_57 : f32 to vector<256x128xf32>
    %66 = arith.maximumf %64, %65 : vector<256x128xf32>
    %67 = vector.shape_cast %66 : vector<256x128xf32> to vector<16x16x128xf32>
    %c0_58 = arith.constant 0 : index
    %c0_59 = arith.constant 0 : index
    %c0_60 = arith.constant 0 : index
    %c0_61 = arith.constant 0 : index
    %68 = vector.load %arg6[%c0_58, %c0_59, %c0_60, %c0_61] : memref<1x16x16x128xf32, #tpu.memory_space<vmem>>, vector<1x16x16x128xf32>
    %69 = vector.shape_cast %68 : vector<1x16x16x128xf32> to vector<16x16x128xf32>
    %70 = vector.shape_cast %67 : vector<16x16x128xf32> to vector<1x16x16x128xf32>
    tpu.vector_store %arg6[%c0_58, %c0_59, %c0_60, %c0_61], %70 {strides = array<i32>} : memref<1x16x16x128xf32, #tpu.memory_space<vmem>>, vector<1x16x16x128xf32>,
    return
  }
  func.func @transform_0(%arg0: i32, %arg1: i32) -> (i32, i32, i32, i32) {
    %c0_i32 = arith.constant 0 : i32
    %c0_i32_0 = arith.constant 0 : i32
    %c0_i32_1 = arith.constant 0 : i32
    %c0_i32_2 = arith.constant 0 : i32
    return %arg0, %c0_i32, %c0_i32_0, %c0_i32_1 : i32, i32, i32, i32
  }
  func.func @transform_1(%arg0: i32, %arg1: i32) -> (i32, i32, i32, i32) {
    %c0_i32 = arith.constant 0 : i32
    %c0_i32_0 = arith.constant 0 : i32
    %c0_i32_1 = arith.constant 0 : i32
    %c0_i32_2 = arith.constant 0 : i32
    return %c0_i32, %c0_i32_0, %c0_i32_1, %arg1 : i32, i32, i32, i32
  }
  func.func @transform_2(%arg0: i32, %arg1: i32) -> (i32, i32) {
    %c0_i32 = arith.constant 0 : i32
    %c0_i32_0 = arith.constant 0 : i32
    return %c0_i32, %arg1 : i32, i32
  }
  func.func @transform_3(%arg0: i32, %arg1: i32) -> (i32, i32) {
    %c0_i32 = arith.constant 0 : i32
    %c0_i32_0 = arith.constant 0 : i32
    return %c0_i32, %arg1 : i32, i32
  }
  func.func @transform_4(%arg0: i32, %arg1: i32) -> (i32, i32, i32, i32) {
    %c0_i32 = arith.constant 0 : i32
    %c0_i32_0 = arith.constant 0 : i32
    %c0_i32_1 = arith.constant 0 : i32
    return %arg0, %c0_i32, %c0_i32_0, %arg1 : i32, i32, i32, i32
  }
}

</mosaic_0001>

<bundles_post_ra>
// kernel: tpu_custom_call.1
= control target key start
LH: loop header
LB: loop body
LE: loop exit
PB: predicated region body
PF: predicated region fallthrough
CT: control target
= control target key end

     0   :  { %9 = vsyncpa [#allocation3], 0  ;;  %s6218_s0 = inlined_call_operand.vmem [shape: f32[2,18,18,128], index: 0, kind: input, shape index: {}]   ;;  %s6219_s1 = inlined_call_operand.vmem [shape: f32[3,3,128,128], index: 1, kind: input, shape index: {}]   ;;  %s6220_s2 = inlined_call_operand.vmem [shape: f32[1,128], index: 2, kind: input, shape index: {}]   ;;  %s6221_s3 = inlined_call_operand.vmem [shape: f32[1,128], index: 3, kind: input, shape index: {}]   ;;  %s6222_s4 = inlined_call_operand.hbm [shape: f32[2,16,16,128], index: 4, kind: output, shape index: {}]  }
   0x1   :  { %11 = vsyncpa [#allocation3 + $0x1], 0  ;;  %s4526_s15 = smov 0   ;;  %s4528_s16 = smov 0  }
   0x2   :  { %s4530_s17 = smov 0   ;;  %s4532_s18 = smov 0  }
   0x3   :  { %s4534_s19 = smov 0   ;;  %s4536_s20 = smov 0  }
   0x4 LB: > { %s3032_s21 = sadd.s32 4294967295, %s4496_s20   ;;  %s3033_s22 = sadd.s32 4294967294, %s4496_s20   ;;  %s4496_s20 = sphi %s4536_s20, %s17_s20   ;;  %s4492_s19 = sphi %s4534_s19, %s6317_s19   ;;  %s4488_s18 = sphi %s4532_s18, %s6316_s18   ;;  %s4484_s17 = sphi %s4530_s17, %s6315_s17   ;;  %s4480_s16 = sphi %s4528_s16, %s6314_s16   ;;  %s4476_s15 = sphi %s4526_s15, %s6313_s15  }
   0x5   : > { %s29_s23 = sadd.s32 1, %s4492_s19  ;;  %s142_s24 = sadd.s32 1, %s4484_s17 }
   0x6   : > { %p31_p0 = scmp.ge.s32.totalorder %s29_s23, 2  ;;  %p152_p1 = scmp.ne.s32.totalorder %s4484_s17, %s4480_s16 }
   0x7   : > { %p153_p2 = scmp.eq.s32.totalorder %s3032_s21, 1  ;;  %p158_p3 = scmp.ne.s32.totalorder %s4480_s16, %s4476_s15 }
   0x8   : > { %s6319_s23 = smov (%p31_p0, %s29_s23), 0  ;;  %p159_p5 = scmp.eq.s32.totalorder %s3033_s22, 1 }
   0x9   : > { %p4566_p4 = por %p153_p2, %p152_p1  ;;  %s137_s26 = ssub.s32 %s4492_s19, %s6319_s23 }
   0xa   : > { %p3039_p6 = scmp.ge.s32.totalorder %s4496_s20, 1  ;;  %p140_p7 = scmp.eq.s32.totalorder %s137_s26, 0 }
   0xb   : > { %p4573_p8 = por %p159_p5, %p158_p3  ;;  %p204_p9 = scmp.lt.s32.totalorder %s4496_s20, 3 }
   0xc   : > { %s4579_s28 = scalar_select %p140_p7, %s4484_s17, %s142_s24  }
   0xd   : > { %p205_p10 = pnand %p3039_p6, %p204_p9 }
   0xf   : > { %208 = sbr.rel (%p205_p10) target bundleno = 572 (0x23c), region = 36 }
  0x14   : > { %v3057_v0 = vld [vmem:[%s6219_s1 + $0x1f8] sm:$0xff]  ;;  %v3056_v1 = vld [vmem:[%s6219_s1 + $0x1f0] sm:$0xff]  ;;  %v3055_v2 = vld [vmem:[%s6219_s1 + $0x1e8] sm:$0xff]  ;;  %p240_p11 = scmp.lt.s32.totalorder %s4488_s18, 1  ;;  %s3177_s21 = sshll.u32 %s4488_s18, 12 }
  0x15   : > { %4330 = vmatprep.subr.mxu1 %v3057_v0  ;;  %3610 = vmatprep.subr.mxu0 %v3057_v0  ;;  %v3054_v3 = vld [vmem:[%s6219_s1 + $0x1e0] sm:$0xff]  ;;  %v3053_v4 = vld [vmem:[%s6219_s1 + $0x1d8] sm:$0xff]  ;;  %v3052_v5 = vld [vmem:[%s6219_s1 + $0x1d0] sm:$0xff]  ;;  %s6165_s29 = scalar_lea.hbm %s6222_s4, %s3177_s21  ;;  %s4498_s6 = smov [#allocation2]  }
  0x16   : > { %4346 = vmatpush3.msra.mxu1 %v3057_v0  ;;  %3611 = vmatpush3.msra.mxu0 %v3057_v0  ;;  %v3051_v6 = vld [vmem:[%s6219_s1 + $0x1c8] sm:$0xff]  ;;  %v3050_v7 = vld [vmem:[%s6219_s1 + $0x1c0] sm:$0xff]  ;;  %v3049_v8 = vld [vmem:[%s6219_s1 + $0x1b8] sm:$0xff]  ;;  %s241_s9 = scalar_select %p240_p11, %s4488_s18, 1 }
  0x17   : > { %4331 = vmatprep.subr.mxu1 %v3056_v1  ;;  %3612 = vmatprep.subr.mxu0 %v3056_v1  ;;  %v3048_v9 = vld [vmem:[%s6219_s1 + $0x1b0] sm:$0xff]  ;;  %v3047_v10 = vld [vmem:[%s6219_s1 + $0x1a8] sm:$0xff]  ;;  %v3046_v11 = vld [vmem:[%s6219_s1 + $0x1a0] sm:$0xff]  ;;  %s4424_s7 = sshll.u32 %s4498_s6, 4  ;;  %s4425_s7 = int_to_ptr.vmem [resolvable:$false] %s4424_s7 }
  0x18   : > { %4347 = vmatpush3.msra.mxu1 %v3056_v1  ;;  %3613 = vmatpush3.msra.mxu0 %v3056_v1  ;;  %v3045_v12 = vld [vmem:[%s6219_s1 + $0x198] sm:$0xff]  ;;  %s4362_s14 = smul.u32 432, %s241_s9  ;;  %v3044_v13 = vld [vmem:[%s6219_s1 + $0x190] sm:$0xff]  ;;  %v3043_v14 = vld [vmem:[%s6219_s1 + $0x188] sm:$0xff]  ;;  %s4426_s8 = scalar_lea.vmem %s4425_s7, 8192 }
  0x19   : > { %4332 = vmatprep.subr.mxu1 %v3055_v2  ;;  %3614 = vmatprep.subr.mxu0 %v3055_v2  ;;  %v3042_v15 = vld [vmem:[%s6219_s1 + $0x180] sm:$0xff]  ;;  %v306_v19 = vld [vmem:[%s6219_s1 + $0x78] sm:$0xff]  ;;  %v305_v22 = vld [vmem:[%s6219_s1 + $0x70] sm:$0xff] }
  0x1a   : > { %4348 = vmatpush3.msra.mxu1 %v3055_v2  ;;  %3615 = vmatpush3.msra.mxu0 %v3055_v2  ;;  %s4631_s5 = scalar_lea.vmem %s6218_s0, %s4362_s14  ;;  %v3073_v21 = vld [vmem:[%s6219_s1 + $0x378] sm:$0xff]  ;;  %v3072_v24 = vld [vmem:[%s6219_s1 + $0x370] sm:$0xff]  ;;  %v304_v27 = vld [vmem:[%s6219_s1 + $0x68] sm:$0xff] }
  0x1b   : > { %4333 = vmatprep.subr.mxu1 %v3054_v3  ;;  %3616 = vmatprep.subr.mxu0 %v3054_v3  ;;  %v4637_v16 = vld [vmem:[%s4631_s5 + $0xd8] sm:$0xff]  ;;  %v4643_v18 = vld [vmem:[%s4631_s5 + $0xe0] sm:$0xff]  ;;  %v4661_v23 = vld [vmem:[%s4631_s5 + $0xf0] sm:$0xff] }
  0x1c   : > { %4349 = vmatpush3.msra.mxu1 %v3054_v3  ;;  %3617 = vmatpush3.msra.mxu0 %v3054_v3  ;;  %v4640_v17 = vld [vmem:[%s4631_s5 + $0x18] sm:$0xff]  ;;  %v4650_v20 = vld [vmem:[%s4631_s5 + $0x20] sm:$0xff]  ;;  %v4668_v25 = vld [vmem:[%s4631_s5 + $0x30] sm:$0xff] }
  0x1d   : > { %4334 = vmatprep.subr.mxu1 %v3053_v4  ;;  %3618 = vmatprep.subr.mxu0 %v3053_v4  ;;  %v4671_v26 = vld [vmem:[%s4631_s5 + $0xf8] sm:$0xff]  ;;  %v3071_v29 = vld [vmem:[%s6219_s1 + $0x368] sm:$0xff]  ;;  %v303_v30 = vld [vmem:[%s6219_s1 + $0x60] sm:$0xff] }
  0x1e   : > { %4350 = vmatpush3.msra.mxu1 %v3053_v4  ;;  %3619 = vmatpush3.msra.mxu0 %v3053_v4  ;;  %v4678_v28 = vld [vmem:[%s4631_s5 + $0x38] sm:$0xff]  ;;  %v4689_v31 = vld [vmem:[%s4631_s5 + $0x108] sm:$0xff]  ;;  %v3070_v32 = vld [vmem:[%s6219_s1 + $0x360] sm:$0xff] }
  0x1f   : > { %4335 = vmatprep.subr.mxu1 %v3052_v5  ;;  %3620 = vmatprep.subr.mxu0 %v3052_v5  ;;  %v4696_v33 = vld [vmem:[%s4631_s5 + $0x48] sm:$0xff]  ;;  %v4699_v34 = vld [vmem:[%s4631_s5 + $0x110] sm:$0xff]  ;;  %v302_v35 = vld [vmem:[%s6219_s1 + $0x58] sm:$0xff] }
  0x20   : > { %4351 = vmatpush3.msra.mxu1 %v3052_v5  ;;  %3621 = vmatpush3.msra.mxu0 %v3052_v5  ;;  %v4706_v36 = vld [vmem:[%s4631_s5 + $0x50] sm:$0xff]  ;;  %v3069_v37 = vld [vmem:[%s6219_s1 + $0x358] sm:$0xff]  ;;  %v4717_v39 = vld [vmem:[%s4631_s5 + $0x120] sm:$0xff] }
  0x21   : > { %4336 = vmatprep.subr.mxu1 %v3051_v6  ;;  %3622 = vmatprep.subr.mxu0 %v3051_v6  ;;  %v301_v38 = vld [vmem:[%s6219_s1 + $0x50] sm:$0xff]  ;;  %v4724_v41 = vld [vmem:[%s4631_s5 + $0x60] sm:$0xff]  ;;  %v4727_v42 = vld [vmem:[%s4631_s5 + $0x128] sm:$0xff] }
  0x22   : > { %4352 = vmatpush3.msra.mxu1 %v3051_v6  ;;  %3623 = vmatpush3.msra.mxu0 %v3051_v6  ;;  %v3068_v40 = vld [vmem:[%s6219_s1 + $0x350] sm:$0xff]  ;;  %v300_v43 = vld [vmem:[%s6219_s1 + $0x48] sm:$0xff]  ;;  %v299_v46 = vld [vmem:[%s6219_s1 + $0x40] sm:$0xff] }
  0x23   : > { %4337 = vmatprep.subr.mxu1 %v3050_v7  ;;  %3624 = vmatprep.subr.mxu0 %v3050_v7  ;;  %v4734_v44 = vld [vmem:[%s4631_s5 + $0x68] sm:$0xff]  ;;  %v4745_v47 = vld [vmem:[%s4631_s5 + $0x138] sm:$0xff]  ;;  %v3066_v48 = vld [vmem:[%s6219_s1 + $0x340] sm:$0xff] }
  0x24   : > { %4353 = vmatpush3.msra.mxu1 %v3050_v7  ;;  %3625 = vmatpush3.msra.mxu0 %v3050_v7  ;;  %v3067_v45 = vld [vmem:[%s6219_s1 + $0x348] sm:$0xff]  ;;  %v4752_v49 = vld [vmem:[%s4631_s5 + $0x78] sm:$0xff]  ;;  %v4755_v50 = vld [vmem:[%s4631_s5 + $0x140] sm:$0xff] }
  0x25   : > { %4338 = vmatprep.subr.mxu1 %v3049_v8  ;;  %3626 = vmatprep.subr.mxu0 %v3049_v8  ;;  %v298_v51 = vld [vmem:[%s6219_s1 + $0x38] sm:$0xff]  ;;  %v4762_v52 = vld [vmem:[%s4631_s5 + $0x80] sm:$0xff]  ;;  %v297_v54 = vld [vmem:[%s6219_s1 + $0x30] sm:$0xff] }
  0x26   : > { %4354 = vmatpush3.msra.mxu1 %v3049_v8  ;;  %3627 = vmatpush3.msra.mxu0 %v3049_v8  ;;  %v3065_v53 = vld [vmem:[%s6219_s1 + $0x338] sm:$0xff]  ;;  %v4773_v55 = vld [vmem:[%s4631_s5 + $0x150] sm:$0xff]  ;;  %v296_v59 = vld [vmem:[%s6219_s1 + $0x28] sm:$0xff] }
  0x27   : > { %4339 = vmatprep.subr.mxu1 %v3048_v9  ;;  %3628 = vmatprep.subr.mxu0 %v3048_v9  ;;  %v3064_v56 = vld [vmem:[%s6219_s1 + $0x330] sm:$0xff]  ;;  %v4783_v58 = vld [vmem:[%s4631_s5 + $0x158] sm:$0xff]  ;;  %v3063_v61 = vld [vmem:[%s6219_s1 + $0x328] sm:$0xff] }
  0x28   : > { %4355 = vmatpush3.msra.mxu1 %v3048_v9  ;;  %3629 = vmatpush3.msra.mxu0 %v3048_v9  ;;  %v4780_v57 = vld [vmem:[%s4631_s5 + $0x90] sm:$0xff]  ;;  %v4790_v60 = vld [vmem:[%s4631_s5 + $0x98] sm:$0xff]  ;;  %v295_v62 = vld [vmem:[%s6219_s1 + $0x20] sm:$0xff] }
  0x29   : > { %4340 = vmatprep.subr.mxu1 %v3047_v10  ;;  %3630 = vmatprep.subr.mxu0 %v3047_v10  ;;  %v4801_v63 = vld [vmem:[%s4631_s5 + $0x168] sm:$0xff]  ;;  %v3062_v0 = vld [vmem:[%s6219_s1 + $0x320] sm:$0xff]  ;;  %v4811_v2 = vld [vmem:[%s4631_s5 + $0x170] sm:$0xff] }
  0x2a   : > { %4356 = vmatpush3.msra.mxu1 %v3047_v10  ;;  %3631 = vmatpush3.msra.mxu0 %v3047_v10  ;;  %v4808_v1 = vld [vmem:[%s4631_s5 + $0xa8] sm:$0xff]  ;;  %v294_v3 = vld [vmem:[%s6219_s1 + $0x18] sm:$0xff]  ;;  %v4818_v4 = vld [vmem:[%s4631_s5 + $0xb0] sm:$0xff] }
  0x2b   : > { %4341 = vmatprep.subr.mxu1 %v3046_v11  ;;  %3632 = vmatprep.subr.mxu0 %v3046_v11  ;;  %v3061_v5 = vld [vmem:[%s6219_s1 + $0x318] sm:$0xff]  ;;  %v293_v6 = vld [vmem:[%s6219_s1 + $0x10] sm:$0xff]  ;;  %v4829_v7 = vld [vmem:[%s4631_s5 + $0x180] sm:$0xff] }
  0x2c   : > { %4357 = vmatpush3.msra.mxu1 %v3046_v11  ;;  %3633 = vmatpush3.msra.mxu0 %v3046_v11  ;;  %v3060_v8 = vld [vmem:[%s6219_s1 + $0x310] sm:$0xff]  ;;  %v4836_v9 = vld [vmem:[%s4631_s5 + $0xc0] sm:$0xff]  ;;  %v4839_v10 = vld [vmem:[%s4631_s5 + $0x188] sm:$0xff] }
  0x2d   : > { %4342 = vmatprep.subr.mxu1 %v3045_v12  ;;  %3634 = vmatprep.subr.mxu0 %v3045_v12  ;;  %v292_v11 = vld [vmem:[%s6219_s1 + $0x8] sm:$0xff] }
  0x2e   : > { %4358 = vmatpush3.msra.mxu1 %v3045_v12  ;;  %3635 = vmatpush3.msra.mxu0 %v3045_v12  ;;  %v4846_v12 = vld [vmem:[%s4631_s5 + $0xc8] sm:$0xff] }
  0x2f   : > { %4343 = vmatprep.subr.mxu1 %v3044_v13  ;;  %3636 = vmatprep.subr.mxu0 %v3044_v13 }
  0x30   : > { %4359 = vmatpush3.msra.mxu1 %v3044_v13  ;;  %3637 = vmatpush3.msra.mxu0 %v3044_v13  ;;  %v3059_v13 = vld [vmem:[%s6219_s1 + $0x308] sm:$0xff] }
  0x31   : > { %4344 = vmatprep.subr.mxu1 %v3043_v14  ;;  %3638 = vmatprep.subr.mxu0 %v3043_v14 }
  0x32   : > { %4360 = vmatpush3.msra.mxu1 %v3043_v14  ;;  %3639 = vmatpush3.msra.mxu0 %v3043_v14  ;;  %v291_v14 = vld [vmem:[%s6219_s1] sm:$0xff] }
  0x33   : > { %4345 = vmatprep.subr.mxu1 %v3042_v15  ;;  %3640 = vmatprep.subr.mxu0 %v3042_v15 }
  0x34   : > { %4361 = vmatpush3.msra.mxu1 %v3042_v15  ;;  %3666 = vmatprep.mubr.f32.mxu1 %v4637_v16 }
  0x35   : > { %3641 = vmatpush3.msra.mxu0 %v3042_v15  ;;  %3642 = vmatprep.mubr.f32.mxu0 %v4640_v17  ;;  %v255_v15 = vld [vmem:[%s4631_s5] sm:$0xff] }
  0x36   : > { %3667 = vmatmul.mubr.f32.vlgmr.msra.gmra.mxu1 %v4643_v18  ;;  %3690 = vmatprep.subr.mxu1 %v306_v19 }
  0x37   : > { %3643 = vmatmul.mubr.f32.vlgmr.msra.gmra.mxu0 %v4650_v20  ;;  %3691 = vmatpush3.msra.mxu1 %v306_v19  ;;  %v3058_v19 = vld [vmem:[%s6219_s1 + $0x300] sm:$0xff] }
  0x38   : > { %3770 = vmatprep.subr.mxu0 %v3073_v21  ;;  %3692 = vmatprep.subr.mxu1 %v305_v22 }
  0x39   : > { %3771 = vmatpush3.msra.mxu0 %v3073_v21  ;;  %3669 = vmatprep.mubr.f32.mxu1 %v4661_v23  ;;  %v256_v21 = vld [vmem:[%s4631_s5 + $0x8] sm:$0xff] }
  0x3a   : > { %3693 = vmatpush3.msra.mxu1 %v305_v22  ;;  %3772 = vmatprep.subr.mxu0 %v3072_v24  ;;  %v3089_v22 = vld [vmem:[%s6219_s1 + $0xf8] sm:$0xff] }
  0x3b   : > { %3645 = vmatprep.mubr.f32.mxu0 %v4668_v25  ;;  %3670 = vmatmul.mubr.f32.gmra.mxu1 %v4671_v26 }
  0x3c   : > { %3694 = vmatprep.subr.mxu1 %v304_v27  ;;  %3773 = vmatpush3.msra.mxu0 %v3072_v24  ;;  %v3105_v24 = vld [vmem:[%s6219_s1 + $0x278] sm:$0xff] }
  0x3d   : > { %3646 = vmatmul.mubr.f32.gmra.mxu0 %v4678_v28  ;;  %3695 = vmatpush3.msra.mxu1 %v304_v27  ;;  %v3088_v27 = vld [vmem:[%s6219_s1 + $0xf0] sm:$0xff] }
  0x3e   : > { %3774 = vmatprep.subr.mxu0 %v3071_v29  ;;  %3696 = vmatprep.subr.mxu1 %v303_v30 }
  0x3f   : > { %3775 = vmatpush3.msra.mxu0 %v3071_v29  ;;  %3672 = vmatprep.mubr.f32.mxu1 %v4689_v31  ;;  %v3104_v29 = vld [vmem:[%s6219_s1 + $0x270] sm:$0xff] }
  0x40   : > { %3697 = vmatpush3.msra.mxu1 %v303_v30  ;;  %3776 = vmatprep.subr.mxu0 %v3070_v32  ;;  %v3087_v30 = vld [vmem:[%s6219_s1 + $0xe8] sm:$0xff] }
  0x41   : > { %3648 = vmatprep.mubr.f32.mxu0 %v4696_v33  ;;  %3673 = vmatmul.mubr.f32.gmra.mxu1 %v4699_v34 }
  0x42   : > { %3698 = vmatprep.subr.mxu1 %v302_v35  ;;  %3777 = vmatpush3.msra.mxu0 %v3070_v32  ;;  %v3101_v32 = vld [vmem:[%s6219_s1 + $0x258] sm:$0xff] }
  0x43   : > { %3649 = vmatmul.mubr.f32.gmra.mxu0 %v4706_v36  ;;  %3699 = vmatpush3.msra.mxu1 %v302_v35  ;;  %v3100_v35 = vld [vmem:[%s6219_s1 + $0x250] sm:$0xff] }
  0x44   : > { %3778 = vmatprep.subr.mxu0 %v3069_v37  ;;  %3700 = vmatprep.subr.mxu1 %v301_v38 }
  0x45   : > { %3779 = vmatpush3.msra.mxu0 %v3069_v37  ;;  %3675 = vmatprep.mubr.f32.mxu1 %v4717_v39  ;;  %v3099_v37 = vld [vmem:[%s6219_s1 + $0x248] sm:$0xff] }
  0x46   : > { %3701 = vmatpush3.msra.mxu1 %v301_v38  ;;  %3780 = vmatprep.subr.mxu0 %v3068_v40  ;;  %v3082_v38 = vld [vmem:[%s6219_s1 + $0xc0] sm:$0xff] }
  0x47   : > { %3651 = vmatprep.mubr.f32.mxu0 %v4724_v41  ;;  %3676 = vmatmul.mubr.f32.gmra.mxu1 %v4727_v42 }
  0x48   : > { %3702 = vmatprep.subr.mxu1 %v300_v43  ;;  %3781 = vmatpush3.msra.mxu0 %v3068_v40  ;;  %v3098_v40 = vld [vmem:[%s6219_s1 + $0x240] sm:$0xff] }
  0x49   : > { %3652 = vmatmul.mubr.f32.gmra.mxu0 %v4734_v44  ;;  %3703 = vmatpush3.msra.mxu1 %v300_v43  ;;  %v3097_v43 = vld [vmem:[%s6219_s1 + $0x238] sm:$0xff] }
  0x4a   : > { %3782 = vmatprep.subr.mxu0 %v3067_v45  ;;  %3704 = vmatprep.subr.mxu1 %v299_v46 }
  0x4b   : > { %3783 = vmatpush3.msra.mxu0 %v3067_v45  ;;  %3678 = vmatprep.mubr.f32.mxu1 %v4745_v47  ;;  %v3096_v45 = vld [vmem:[%s6219_s1 + $0x230] sm:$0xff] }
  0x4c   : > { %3705 = vmatpush3.msra.mxu1 %v299_v46  ;;  %3784 = vmatprep.subr.mxu0 %v3066_v48  ;;  %v3079_v46 = vld [vmem:[%s6219_s1 + $0xa8] sm:$0xff] }
  0x4d   : > { %3654 = vmatprep.mubr.f32.mxu0 %v4752_v49  ;;  %3679 = vmatmul.mubr.f32.gmra.mxu1 %v4755_v50 }
  0x4e   : > { %3706 = vmatprep.subr.mxu1 %v298_v51  ;;  %3785 = vmatpush3.msra.mxu0 %v3066_v48  ;;  %v289_v48 = vld [vmem:[%s4631_s5 + $0x198] sm:$0xff] }
  0x4f   : > { %3655 = vmatmul.mubr.f32.gmra.mxu0 %v4762_v52  ;;  %3707 = vmatpush3.msra.mxu1 %v298_v51  ;;  %v3090_v51 = vld [vmem:[%s6219_s1 + $0x200] sm:$0xff] }
  0x50   : > { %3786 = vmatprep.subr.mxu0 %v3065_v53  ;;  %3708 = vmatprep.subr.mxu1 %v297_v54 }
  0x51   : > { %3787 = vmatpush3.msra.mxu0 %v3065_v53  ;;  %3681 = vmatprep.mubr.f32.mxu1 %v4773_v55  ;;  %v1049_v53 = vld [vmem:[%s4631_s5 + $0x9] sm:$0xff] }
  0x52   : > { %3709 = vmatpush3.msra.mxu1 %v297_v54  ;;  %3788 = vmatprep.subr.mxu0 %v3064_v56  ;;  %v1050_v54 = vld [vmem:[%s4631_s5 + $0x19] sm:$0xff] }
  0x53   : > { %3657 = vmatprep.mubr.f32.mxu0 %v4780_v57  ;;  %3682 = vmatmul.mubr.f32.gmra.mxu1 %v4783_v58 }
  0x54   : > { %3710 = vmatprep.subr.mxu1 %v296_v59  ;;  %3789 = vmatpush3.msra.mxu0 %v3064_v56  ;;  %v1051_v56 = vld [vmem:[%s4631_s5 + $0x21] sm:$0xff] }
  0x55   : > { %3658 = vmatmul.mubr.f32.gmra.mxu0 %v4790_v60  ;;  %3711 = vmatpush3.msra.mxu1 %v296_v59  ;;  %v3120_v59 = vld [vmem:[%s6219_s1 + $0x3f0] sm:$0xff] }
  0x56   : > { %3790 = vmatprep.subr.mxu0 %v3063_v61  ;;  %3712 = vmatprep.subr.mxu1 %v295_v62 }
  0x57   : > { %3791 = vmatpush3.msra.mxu0 %v3063_v61  ;;  %3684 = vmatprep.mubr.f32.mxu1 %v4801_v63  ;;  %v3136_v61 = vld [vmem:[%s6219_s1 + $0x170] sm:$0xff] }
  0x58   : > { %3713 = vmatpush3.msra.mxu1 %v295_v62  ;;  %3792 = vmatprep.subr.mxu0 %v3062_v0  ;;  %v5045_v62 = vld [vmem:[%s4631_s5 + $0x49] sm:$0xff] }
  0x59   : > { %3660 = vmatprep.mubr.f32.mxu0 %v4808_v1  ;;  %3685 = vmatmul.mubr.f32.gmra.mxu1 %v4811_v2 }
  0x5a   : > { %3714 = vmatprep.subr.mxu1 %v294_v3  ;;  %3793 = vmatpush3.msra.mxu0 %v3062_v0  ;;  %v5052_v0 = vld [vmem:[%s4631_s5 + $0x51] sm:$0xff] }
  0x5b   : > { %3661 = vmatmul.mubr.f32.gmra.mxu0 %v4818_v4  ;;  %3715 = vmatpush3.msra.mxu1 %v294_v3  ;;  %v3118_v3 = vld [vmem:[%s6219_s1 + $0x3e0] sm:$0xff] }
  0x5c   : > { %3794 = vmatprep.subr.mxu0 %v3061_v5  ;;  %3716 = vmatprep.subr.mxu1 %v293_v6 }
  0x5d   : > { %3795 = vmatpush3.msra.mxu0 %v3061_v5  ;;  %3687 = vmatprep.mubr.f32.mxu1 %v4829_v7  ;;  %v3134_v5 = vld [vmem:[%s6219_s1 + $0x160] sm:$0xff] }
  0x5e   : > { %3717 = vmatpush3.msra.mxu1 %v293_v6  ;;  %3796 = vmatprep.subr.mxu0 %v3060_v8  ;;  %v5077_v6 = vld [vmem:[%s4631_s5 + $0x79] sm:$0xff] }
  0x5f   : > { %3663 = vmatprep.mubr.f32.mxu0 %v4836_v9  ;;  %3688 = vmatmul.mubr.f32.gmra.mxu1 %v4839_v10 }
  0x60   : > { %3718 = vmatprep.subr.mxu1 %v292_v11  ;;  %3797 = vmatpush3.msra.mxu0 %v3060_v8  ;;  %v5084_v8 = vld [vmem:[%s4631_s5 + $0x81] sm:$0xff] }
  0x61   : > { %3664 = vmatmul.mubr.f32.gmra.mxu0 %v4846_v12  ;;  %3719 = vmatpush3.msra.mxu1 %v292_v11  ;;  %v3116_v11 = vld [vmem:[%s6219_s1 + $0x3d0] sm:$0xff] }
  0x62   : > { %3798 = vmatprep.subr.mxu0 %v3059_v13  ;;  %3720 = vmatprep.subr.mxu1 %v291_v14 }
  0x63   : > { %3799 = vmatpush3.msra.mxu0 %v3059_v13  ;;  %3721 = vmatpush3.msra.mxu1 %v291_v14  ;;  %v3132_v13 = vld [vmem:[%s6219_s1 + $0x150] sm:$0xff] }
  0x64   : > { %3722 = vmatprep.mubr.f32.mxu1 %v255_v15  ;;  %3800 = vmatprep.subr.mxu0 %v3058_v19  ;;  %v5109_v14 = vld [vmem:[%s4631_s5 + $0xa9] sm:$0xff] }
  0x65   : > { %3723 = vmatmul.mubr.f32.vlgmr.msra.gmra.mxu1 %v256_v21  ;;  %3801 = vmatpush3.msra.mxu0 %v3058_v19  ;;  %v3115_v15 = vld [vmem:[%s6219_s1 + $0x3c8] sm:$0xff]  ;;  %v5116_v19 = vld [vmem:[%s4631_s5 + $0xb1] sm:$0xff] }
  0x66   : > { %3802 = vmatprep.mubr.f32.mxu0 %v4668_v25  ;;  %3850 = vmatprep.subr.mxu1 %v3089_v22  ;;  %v3131_v21 = vld [vmem:[%s6219_s1 + $0x148] sm:$0xff] }
  0x67   : > { %3803 = vmatmul.mubr.f32.vlgmr.msra.gmra.mxu0 %v4678_v28  ;;  %3851 = vmatpush3.msra.mxu1 %v3089_v22  ;;  %v5125_v22 = vld [vmem:[%s4631_s5 + $0xc1] sm:$0xff] }
  0x68   : > { %3930 = vmatprep.subr.mxu0 %v3105_v24  ;;  %3725 = vmatprep.mubr.f32.mxu1 %v4640_v17  ;;  %v3103_v17 = vld [vmem:[%s6219_s1 + $0x268] sm:$0xff] }
  0x69   : > { %3931 = vmatpush3.msra.mxu0 %v3105_v24  ;;  %3726 = vmatmul.mubr.f32.gmra.mxu1 %v4650_v20  ;;  %v3086_v20 = vld [vmem:[%s6219_s1 + $0xe0] sm:$0xff] }
  0x6a   : > { %3805 = vmatprep.mubr.f32.mxu0 %v4696_v33  ;;  %3852 = vmatprep.subr.mxu1 %v3088_v27  ;;  %v3114_v24 = vld [vmem:[%s6219_s1 + $0x3c0] sm:$0xff] }
  0x6b   : > { %3806 = vmatmul.mubr.f32.gmra.mxu0 %v4706_v36  ;;  %3853 = vmatpush3.msra.mxu1 %v3088_v27  ;;  %v5132_v27 = vld [vmem:[%s4631_s5 + $0xc9] sm:$0xff] }
  0x6c   : > { %3932 = vmatprep.subr.mxu0 %v3104_v29  ;;  %3728 = vmatprep.mubr.f32.mxu1 %v4668_v25  ;;  %v3102_v25 = vld [vmem:[%s6219_s1 + $0x260] sm:$0xff] }
  0x6d   : > { %3933 = vmatpush3.msra.mxu0 %v3104_v29  ;;  %3729 = vmatmul.mubr.f32.gmra.mxu1 %v4678_v28  ;;  %v3085_v28 = vld [vmem:[%s6219_s1 + $0xd8] sm:$0xff]  ;;  %v3130_v29 = vld [vmem:[%s6219_s1 + $0x140] sm:$0xff] }
  0x6e   : > { %3808 = vmatprep.mubr.f32.mxu0 %v4724_v41  ;;  %3854 = vmatprep.subr.mxu1 %v3087_v30 }
  0x6f   : > { %3809 = vmatmul.mubr.f32.gmra.mxu0 %v4734_v44  ;;  %3855 = vmatpush3.msra.mxu1 %v3087_v30  ;;  %v5141_v30 = vld [vmem:[%s4631_s5 + $0xd9] sm:$0xff] }
  0x70   : > { %3934 = vmatprep.subr.mxu0 %v3103_v17  ;;  %3731 = vmatprep.mubr.f32.mxu1 %v4696_v33  ;;  %v3084_v33 = vld [vmem:[%s6219_s1 + $0xd0] sm:$0xff] }
  0x71   : > { %3935 = vmatpush3.msra.mxu0 %v3103_v17  ;;  %3732 = vmatmul.mubr.f32.gmra.mxu1 %v4706_v36  ;;  %v3083_v36 = vld [vmem:[%s6219_s1 + $0xc8] sm:$0xff]  ;;  %v3113_v17 = vld [vmem:[%s6219_s1 + $0x3b8] sm:$0xff] }
  0x72   : > { %3811 = vmatprep.mubr.f32.mxu0 %v4752_v49  ;;  %3856 = vmatprep.subr.mxu1 %v3086_v20 }
  0x73   : > { %3812 = vmatmul.mubr.f32.gmra.mxu0 %v4762_v52  ;;  %3857 = vmatpush3.msra.mxu1 %v3086_v20  ;;  %v5148_v20 = vld [vmem:[%s4631_s5 + $0xe1] sm:$0xff] }
  0x74   : > { %3936 = vmatprep.subr.mxu0 %v3102_v25  ;;  %3734 = vmatprep.mubr.f32.mxu1 %v4724_v41  ;;  %v3081_v41 = vld [vmem:[%s6219_s1 + $0xb8] sm:$0xff] }
  0x75   : > { %3937 = vmatpush3.msra.mxu0 %v3102_v25  ;;  %3735 = vmatmul.mubr.f32.gmra.mxu1 %v4734_v44  ;;  %v3080_v44 = vld [vmem:[%s6219_s1 + $0xb0] sm:$0xff]  ;;  %v3129_v25 = vld [vmem:[%s6219_s1 + $0x138] sm:$0xff] }
  0x76   : > { %3814 = vmatprep.mubr.f32.mxu0 %v4780_v57  ;;  %3858 = vmatprep.subr.mxu1 %v3085_v28 }
  0x77   : > { %3815 = vmatmul.mubr.f32.gmra.mxu0 %v4790_v60  ;;  %3859 = vmatpush3.msra.mxu1 %v3085_v28  ;;  %v5157_v28 = vld [vmem:[%s4631_s5 + $0xf1] sm:$0xff] }
  0x78   : > { %3938 = vmatprep.subr.mxu0 %v3101_v32  ;;  %3737 = vmatprep.mubr.f32.mxu1 %v4752_v49  ;;  %v3074_v49 = vld [vmem:[%s6219_s1 + $0x80] sm:$0xff] }
  0x79   : > { %3939 = vmatpush3.msra.mxu0 %v3101_v32  ;;  %3738 = vmatmul.mubr.f32.gmra.mxu1 %v4762_v52  ;;  %v1048_v52 = vld [vmem:[%s4631_s5 + $0x1] sm:$0xff]  ;;  %v3112_v32 = vld [vmem:[%s6219_s1 + $0x3b0] sm:$0xff] }
  0x7a   : > { %3817 = vmatprep.mubr.f32.mxu0 %v4808_v1  ;;  %3860 = vmatprep.subr.mxu1 %v3084_v33 }
  0x7b   : > { %3818 = vmatmul.mubr.f32.gmra.mxu0 %v4818_v4  ;;  %3861 = vmatpush3.msra.mxu1 %v3084_v33  ;;  %v5164_v33 = vld [vmem:[%s4631_s5 + $0xf9] sm:$0xff] }
  0x7c   : > { %3940 = vmatprep.subr.mxu0 %v3100_v35  ;;  %3740 = vmatprep.mubr.f32.mxu1 %v4780_v57  ;;  %v3137_v57 = vld [vmem:[%s6219_s1 + $0x178] sm:$0xff] }
  0x7d   : > { %3941 = vmatpush3.msra.mxu0 %v3100_v35  ;;  %3741 = vmatmul.mubr.f32.gmra.mxu1 %v4790_v60  ;;  %v5037_v60 = vld [vmem:[%s4631_s5 + $0x39] sm:$0xff]  ;;  %v3128_v35 = vld [vmem:[%s6219_s1 + $0x130] sm:$0xff] }
  0x7e   : > { %3820 = vmatprep.mubr.f32.mxu0 %v4836_v9  ;;  %3862 = vmatprep.subr.mxu1 %v3083_v36 }
  0x7f   : > { %3821 = vmatmul.mubr.f32.gmra.mxu0 %v4846_v12  ;;  %3863 = vmatpush3.msra.mxu1 %v3083_v36  ;;  %v5173_v36 = vld [vmem:[%s4631_s5 + $0x109] sm:$0xff] }
  0x80   : > { %3942 = vmatprep.subr.mxu0 %v3099_v37  ;;  %3743 = vmatprep.mubr.f32.mxu1 %v4808_v1  ;;  %v3135_v1 = vld [vmem:[%s6219_s1 + $0x168] sm:$0xff] }
  0x81   : > { %3943 = vmatpush3.msra.mxu0 %v3099_v37  ;;  %3744 = vmatmul.mubr.f32.gmra.mxu1 %v4818_v4  ;;  %v5068_v4 = vld [vmem:[%s4631_s5 + $0x69] sm:$0xff] }
  0x82   : > { %3823 = vmatprep.mubr.f32.mxu0 %v4637_v16  ;;  %3864 = vmatprep.subr.mxu1 %v3082_v38  ;;  %v3111_v37 = vld [vmem:[%s6219_s1 + $0x3a8] sm:$0xff] }
  0x83   : > { %3824 = vmatmul.mubr.f32.gmra.mxu0 %v4643_v18  ;;  %3865 = vmatpush3.msra.mxu1 %v3082_v38  ;;  %v5180_v38 = vld [vmem:[%s4631_s5 + $0x111] sm:$0xff] }
  0x84   : > { %3944 = vmatprep.subr.mxu0 %v3098_v40  ;;  %3746 = vmatprep.mubr.f32.mxu1 %v4836_v9  ;;  %v3133_v9 = vld [vmem:[%s6219_s1 + $0x158] sm:$0xff] }
  0x85   : > { %3945 = vmatpush3.msra.mxu0 %v3098_v40  ;;  %3747 = vmatmul.mubr.f32.gmra.mxu1 %v4846_v12  ;;  %v5100_v12 = vld [vmem:[%s4631_s5 + $0x99] sm:$0xff]  ;;  %v3127_v40 = vld [vmem:[%s6219_s1 + $0x128] sm:$0xff] }
  0x86   : > { %3826 = vmatprep.mubr.f32.mxu0 %v4661_v23  ;;  %3866 = vmatprep.subr.mxu1 %v3081_v41 }
  0x87   : > { %3827 = vmatmul.mubr.f32.gmra.mxu0 %v4671_v26  ;;  %3867 = vmatpush3.msra.mxu1 %v3081_v41  ;;  %v5189_v41 = vld [vmem:[%s4631_s5 + $0x121] sm:$0xff] }
  0x88   : > { %3946 = vmatprep.subr.mxu0 %v3097_v43  ;;  %3749 = vmatprep.mubr.f32.mxu1 %v4637_v16  ;;  %v3095_v16 = vld [vmem:[%s6219_s1 + $0x228] sm:$0xff] }
  0x89   : > { %3947 = vmatpush3.msra.mxu0 %v3097_v43  ;;  %3750 = vmatmul.mubr.f32.gmra.mxu1 %v4643_v18  ;;  %v3078_v18 = vld [vmem:[%s6219_s1 + $0xa0] sm:$0xff] }
  0x8a   : > { %3829 = vmatprep.mubr.f32.mxu0 %v4689_v31  ;;  %3868 = vmatprep.subr.mxu1 %v3080_v44  ;;  %v3110_v43 = vld [vmem:[%s6219_s1 + $0x3a0] sm:$0xff] }
  0x8b   : > { %3830 = vmatmul.mubr.f32.gmra.mxu0 %v4699_v34  ;;  %3869 = vmatpush3.msra.mxu1 %v3080_v44  ;;  %v5196_v44 = vld [vmem:[%s4631_s5 + $0x129] sm:$0xff] }
  0x8c   : > { %3948 = vmatprep.subr.mxu0 %v3096_v45  ;;  %3752 = vmatprep.mubr.f32.mxu1 %v4661_v23  ;;  %v3094_v23 = vld [vmem:[%s6219_s1 + $0x220] sm:$0xff] }
  0x8d   : > { %3949 = vmatpush3.msra.mxu0 %v3096_v45  ;;  %3753 = vmatmul.mubr.f32.gmra.mxu1 %v4671_v26  ;;  %v3077_v26 = vld [vmem:[%s6219_s1 + $0x98] sm:$0xff]  ;;  %v3126_v45 = vld [vmem:[%s6219_s1 + $0x120] sm:$0xff] }
  0x8e   : > { %3832 = vmatprep.mubr.f32.mxu0 %v4717_v39  ;;  %3870 = vmatprep.subr.mxu1 %v3079_v46 }
  0x8f   : > { %3833 = vmatmul.mubr.f32.gmra.mxu0 %v4727_v42  ;;  %3871 = vmatpush3.msra.mxu1 %v3079_v46  ;;  %v5205_v46 = vld [vmem:[%s4631_s5 + $0x139] sm:$0xff] }
  0x90   : > { %3950 = vmatprep.subr.mxu0 %v3095_v16  ;;  %3755 = vmatprep.mubr.f32.mxu1 %v4689_v31  ;;  %v3093_v31 = vld [vmem:[%s6219_s1 + $0x218] sm:$0xff] }
  0x91   : > { %3951 = vmatpush3.msra.mxu0 %v3095_v16  ;;  %3756 = vmatmul.mubr.f32.gmra.mxu1 %v4699_v34  ;;  %v3076_v34 = vld [vmem:[%s6219_s1 + $0x90] sm:$0xff]  ;;  %v3109_v16 = vld [vmem:[%s6219_s1 + $0x398] sm:$0xff] }
  0x92   : > { %3835 = vmatprep.mubr.f32.mxu0 %v4745_v47  ;;  %3872 = vmatprep.subr.mxu1 %v3078_v18 }
  0x93   : > { %3836 = vmatmul.mubr.f32.gmra.mxu0 %v4755_v50  ;;  %3873 = vmatpush3.msra.mxu1 %v3078_v18  ;;  %v5212_v18 = vld [vmem:[%s4631_s5 + $0x141] sm:$0xff] }
  0x94   : > { %3952 = vmatprep.subr.mxu0 %v3094_v23  ;;  %3758 = vmatprep.mubr.f32.mxu1 %v4717_v39  ;;  %v3092_v39 = vld [vmem:[%s6219_s1 + $0x210] sm:$0xff] }
  0x95   : > { %3953 = vmatpush3.msra.mxu0 %v3094_v23  ;;  %3759 = vmatmul.mubr.f32.gmra.mxu1 %v4727_v42  ;;  %v3075_v42 = vld [vmem:[%s6219_s1 + $0x88] sm:$0xff]  ;;  %v3125_v23 = vld [vmem:[%s6219_s1 + $0x118] sm:$0xff] }
  0x96   : > { %3838 = vmatprep.mubr.f32.mxu0 %v4773_v55  ;;  %3874 = vmatprep.subr.mxu1 %v3077_v26 }
  0x97   : > { %3839 = vmatmul.mubr.f32.gmra.mxu0 %v4783_v58  ;;  %3875 = vmatpush3.msra.mxu1 %v3077_v26  ;;  %v5221_v26 = vld [vmem:[%s4631_s5 + $0x151] sm:$0xff] }
  0x98   : > { %3954 = vmatprep.subr.mxu0 %v3093_v31  ;;  %3761 = vmatprep.mubr.f32.mxu1 %v4745_v47  ;;  %v3091_v47 = vld [vmem:[%s6219_s1 + $0x208] sm:$0xff] }
  0x99   : > { %3955 = vmatpush3.msra.mxu0 %v3093_v31  ;;  %3762 = vmatmul.mubr.f32.gmra.mxu1 %v4755_v50  ;;  %v290_v50 = vld [vmem:[%s4631_s5 + $0x1a0] sm:$0xff]  ;;  %v3108_v31 = vld [vmem:[%s6219_s1 + $0x390] sm:$0xff] }
  0x9a   : > { %3841 = vmatprep.mubr.f32.mxu0 %v4801_v63  ;;  %3876 = vmatprep.subr.mxu1 %v3076_v34 }
  0x9b   : > { %3842 = vmatmul.mubr.f32.gmra.mxu0 %v4811_v2  ;;  %3877 = vmatpush3.msra.mxu1 %v3076_v34  ;;  %v5228_v34 = vld [vmem:[%s4631_s5 + $0x159] sm:$0xff] }
  0x9c   : > { %3956 = vmatprep.subr.mxu0 %v3092_v39  ;;  %3764 = vmatprep.mubr.f32.mxu1 %v4773_v55  ;;  %v3121_v55 = vld [vmem:[%s6219_s1 + $0x3f8] sm:$0xff] }
  0x9d   : > { %3957 = vmatpush3.msra.mxu0 %v3092_v39  ;;  %3765 = vmatmul.mubr.f32.gmra.mxu1 %v4783_v58  ;;  %v5031_v58 = vld [vmem:[%s4631_s5 + $0x31] sm:$0xff] }
  0x9e   : > { %3844 = vmatprep.mubr.f32.mxu0 %v4829_v7  ;;  %3878 = vmatprep.subr.mxu1 %v3075_v42  ;;  %v3117_v7 = vld [vmem:[%s6219_s1 + $0x3d8] sm:$0xff]  ;;  %v3124_v39 = vld [vmem:[%s6219_s1 + $0x110] sm:$0xff] }
  0x9f   : > { %3845 = vmatmul.mubr.f32.gmra.mxu0 %v4839_v10  ;;  %3879 = vmatpush3.msra.mxu1 %v3075_v42  ;;  %v5093_v10 = vld [vmem:[%s4631_s5 + $0x91] sm:$0xff]  ;;  %v5237_v42 = vld [vmem:[%s4631_s5 + $0x169] sm:$0xff] }
  0xa0   : > { %3958 = vmatprep.subr.mxu0 %v3091_v47  ;;  %3767 = vmatprep.mubr.f32.mxu1 %v4801_v63  ;;  %v3119_v63 = vld [vmem:[%s6219_s1 + $0x3e8] sm:$0xff] }
  0xa1   : > { %3959 = vmatpush3.msra.mxu0 %v3091_v47  ;;  %3768 = vmatmul.mubr.f32.gmra.mxu1 %v4811_v2  ;;  %v5061_v2 = vld [vmem:[%s4631_s5 + $0x61] sm:$0xff] }
  0xa2   : > { %3847 = vmatprep.mubr.f32.mxu0 %v289_v48  ;;  %3880 = vmatprep.subr.mxu1 %v3074_v49  ;;  %v3107_v47 = vld [vmem:[%s6219_s1 + $0x388] sm:$0xff]  ;;  %v5244_v48 = vld [vmem:[%s4631_s5 + $0x171] sm:$0xff] }
  0xa3   : > { %3848 = vmatmul.mubr.f32.gmra.mxu0 %v290_v50  ;;  %3881 = vmatpush3.msra.mxu1 %v3074_v49  ;;  %v3123_v49 = vld [vmem:[%s6219_s1 + $0x108] sm:$0xff] }
  0xa4   : > { %3960 = vmatprep.subr.mxu0 %v3090_v51  ;;  %3882 = vmatprep.mubr.f32.mxu1 %v1048_v52  ;;  %v5253_v50 = vld [vmem:[%s4631_s5 + $0x181] sm:$0xff]  ;;  %v5260_v52 = vld [vmem:[%s4631_s5 + $0x189] sm:$0xff] }
  0xa5   : > { %3961 = vmatpush3.msra.mxu0 %v3090_v51  ;;  %3883 = vmatmul.mubr.f32.vlgmr.msra.gmra.mxu1 %v1049_v53  ;;  %v3106_v51 = vld [vmem:[%s6219_s1 + $0x380] sm:$0xff] }
  0xa6   : > { %3962 = vmatprep.mubr.f32.mxu0 %v1050_v54  ;;  %4010 = vmatprep.subr.mxu1 %v3121_v55  ;;  %v3122_v53 = vld [vmem:[%s6219_s1 + $0x100] sm:$0xff] }
  0xa7   : > { %3963 = vmatmul.mubr.f32.vlgmr.msra.gmra.mxu0 %v1051_v56  ;;  %4011 = vmatpush3.msra.mxu1 %v3121_v55  ;;  %v3153_v55 = vld [vmem:[%s6219_s1 + $0x2f8] sm:$0xff] }
  0xa8   : > { %4090 = vmatprep.subr.mxu0 %v3137_v57  ;;  %3885 = vmatprep.mubr.f32.mxu1 %v1050_v54  ;;  %v1906_v54 = vld [vmem:[%s4631_s5 + $0x2] sm:$0xff] }
  0xa9   : > { %4091 = vmatpush3.msra.mxu0 %v3137_v57  ;;  %3886 = vmatmul.mubr.f32.gmra.mxu1 %v1051_v56  ;;  %v1907_v56 = vld [vmem:[%s4631_s5 + $0xa] sm:$0xff]  ;;  %v3169_v57 = vld [vmem:[%s6219_s1 + $0x478] sm:$0xff] }
  0xaa   : > { %3965 = vmatprep.mubr.f32.mxu0 %v5031_v58  ;;  %4012 = vmatprep.subr.mxu1 %v3120_v59 }
  0xab   : > { %3966 = vmatmul.mubr.f32.gmra.mxu0 %v5037_v60  ;;  %4013 = vmatpush3.msra.mxu1 %v3120_v59  ;;  %v5279_v59 = vld [vmem:[%s4631_s5 + $0x1a] sm:$0xff] }
  0xac   : > { %4092 = vmatprep.subr.mxu0 %v3136_v61  ;;  %3888 = vmatprep.mubr.f32.mxu1 %v5031_v58 }
  0xad   : > { %4093 = vmatpush3.msra.mxu0 %v3136_v61  ;;  %3889 = vmatmul.mubr.f32.gmra.mxu1 %v5037_v60  ;;  %v3168_v61 = vld [vmem:[%s6219_s1 + $0x470] sm:$0xff] }
  0xae   : > { %3968 = vmatprep.mubr.f32.mxu0 %v5045_v62  ;;  %4014 = vmatprep.subr.mxu1 %v3119_v63 }
  0xaf   : > { %3969 = vmatmul.mubr.f32.gmra.mxu0 %v5052_v0  ;;  %4015 = vmatpush3.msra.mxu1 %v3119_v63  ;;  %v5295_v63 = vld [vmem:[%s4631_s5 + $0x32] sm:$0xff] }
  0xb0   : > { %4094 = vmatprep.subr.mxu0 %v3135_v1  ;;  %3891 = vmatprep.mubr.f32.mxu1 %v5045_v62 }
  0xb1   : > { %4095 = vmatpush3.msra.mxu0 %v3135_v1  ;;  %3892 = vmatmul.mubr.f32.gmra.mxu1 %v5052_v0  ;;  %v3167_v1 = vld [vmem:[%s6219_s1 + $0x468] sm:$0xff] }
  0xb2   : > { %3971 = vmatprep.mubr.f32.mxu0 %v5061_v2  ;;  %4016 = vmatprep.subr.mxu1 %v3118_v3 }
  0xb3   : > { %3972 = vmatmul.mubr.f32.gmra.mxu0 %v5068_v4  ;;  %4017 = vmatpush3.msra.mxu1 %v3118_v3  ;;  %v5311_v3 = vld [vmem:[%s4631_s5 + $0x4a] sm:$0xff] }
  0xb4   : > { %4096 = vmatprep.subr.mxu0 %v3134_v5  ;;  %3894 = vmatprep.mubr.f32.mxu1 %v5061_v2 }
  0xb5   : > { %4097 = vmatpush3.msra.mxu0 %v3134_v5  ;;  %3895 = vmatmul.mubr.f32.gmra.mxu1 %v5068_v4  ;;  %v3166_v5 = vld [vmem:[%s6219_s1 + $0x460] sm:$0xff] }
  0xb6   : > { %3974 = vmatprep.mubr.f32.mxu0 %v5077_v6  ;;  %4018 = vmatprep.subr.mxu1 %v3117_v7 }
  0xb7   : > { %3975 = vmatmul.mubr.f32.gmra.mxu0 %v5084_v8  ;;  %4019 = vmatpush3.msra.mxu1 %v3117_v7  ;;  %v5327_v7 = vld [vmem:[%s4631_s5 + $0x62] sm:$0xff] }
  0xb8   : > { %4098 = vmatprep.subr.mxu0 %v3133_v9  ;;  %3897 = vmatprep.mubr.f32.mxu1 %v5077_v6 }
  0xb9   : > { %4099 = vmatpush3.msra.mxu0 %v3133_v9  ;;  %3898 = vmatmul.mubr.f32.gmra.mxu1 %v5084_v8  ;;  %v3165_v9 = vld [vmem:[%s6219_s1 + $0x458] sm:$0xff] }
  0xba   : > { %3977 = vmatprep.mubr.f32.mxu0 %v5093_v10  ;;  %4020 = vmatprep.subr.mxu1 %v3116_v11 }
  0xbb   : > { %3978 = vmatmul.mubr.f32.gmra.mxu0 %v5100_v12  ;;  %4021 = vmatpush3.msra.mxu1 %v3116_v11 }
  0xbc   : > { %4100 = vmatprep.subr.mxu0 %v3132_v13  ;;  %3900 = vmatprep.mubr.f32.mxu1 %v5093_v10 }
  0xbd   : > { %4101 = vmatpush3.msra.mxu0 %v3132_v13  ;;  %3901 = vmatmul.mubr.f32.gmra.mxu1 %v5100_v12  ;;  %v5345_v13 = vld [vmem:[%s4631_s5 + $0x7a] sm:$0xff] }
  0xbe   : > { %3980 = vmatprep.mubr.f32.mxu0 %v5109_v14  ;;  %4022 = vmatprep.subr.mxu1 %v3115_v15 }
  0xbf   : > { %3981 = vmatmul.mubr.f32.gmra.mxu0 %v5116_v19  ;;  %4023 = vmatpush3.msra.mxu1 %v3115_v15  ;;  %v5354_v15 = vld [vmem:[%s4631_s5 + $0x82] sm:$0xff] }
  0xc0   : > { %4102 = vmatprep.subr.mxu0 %v3131_v21  ;;  %3903 = vmatprep.mubr.f32.mxu1 %v5109_v14 }
  0xc1   : > { %4103 = vmatpush3.msra.mxu0 %v3131_v21  ;;  %3904 = vmatmul.mubr.f32.gmra.mxu1 %v5116_v19 }
  0xc2   : > { %3983 = vmatprep.mubr.f32.mxu0 %v5125_v22  ;;  %4024 = vmatprep.subr.mxu1 %v3114_v24 }
  0xc3   : > { %3984 = vmatmul.mubr.f32.gmra.mxu0 %v5132_v27  ;;  %4025 = vmatpush3.msra.mxu1 %v3114_v24  ;;  %v3164_v24 = vld [vmem:[%s6219_s1 + $0x450] sm:$0xff] }
  0xc4   : > { %4104 = vmatprep.subr.mxu0 %v3130_v29  ;;  %3906 = vmatprep.mubr.f32.mxu1 %v5125_v22 }
  0xc5   : > { %4105 = vmatpush3.msra.mxu0 %v3130_v29  ;;  %3907 = vmatmul.mubr.f32.gmra.mxu1 %v5132_v27 }
  0xc6   : > { %3986 = vmatprep.mubr.f32.mxu0 %v5141_v30  ;;  %4026 = vmatprep.subr.mxu1 %v3113_v17 }
  0xc7   : > { %3987 = vmatmul.mubr.f32.gmra.mxu0 %v5148_v20  ;;  %4027 = vmatpush3.msra.mxu1 %v3113_v17  ;;  %v3147_v17 = vld [vmem:[%s6219_s1 + $0x2c8] sm:$0xff] }
  0xc8   : > { %4106 = vmatprep.subr.mxu0 %v3129_v25  ;;  %3909 = vmatprep.mubr.f32.mxu1 %v5141_v30 }
  0xc9   : > { %4107 = vmatpush3.msra.mxu0 %v3129_v25  ;;  %3910 = vmatmul.mubr.f32.gmra.mxu1 %v5148_v20  ;;  %v5376_v25 = vld [vmem:[%s4631_s5 + $0x9a] sm:$0xff] }
  0xca   : > { %3989 = vmatprep.mubr.f32.mxu0 %v5157_v28  ;;  %4028 = vmatprep.subr.mxu1 %v3112_v32 }
  0xcb   : > { %3990 = vmatmul.mubr.f32.gmra.mxu0 %v5164_v33  ;;  %4029 = vmatpush3.msra.mxu1 %v3112_v32  ;;  %v3163_v32 = vld [vmem:[%s6219_s1 + $0x448] sm:$0xff] }
  0xcc   : > { %4108 = vmatprep.subr.mxu0 %v3128_v35  ;;  %3912 = vmatprep.mubr.f32.mxu1 %v5157_v28 }
  0xcd   : > { %4109 = vmatpush3.msra.mxu0 %v3128_v35  ;;  %3913 = vmatmul.mubr.f32.gmra.mxu1 %v5164_v33 }
  0xce   : > { %3992 = vmatprep.mubr.f32.mxu0 %v5173_v36  ;;  %4030 = vmatprep.subr.mxu1 %v3111_v37 }
  0xcf   : > { %3993 = vmatmul.mubr.f32.gmra.mxu0 %v5180_v38  ;;  %4031 = vmatpush3.msra.mxu1 %v3111_v37 }
  0xd0   : > { %4110 = vmatprep.subr.mxu0 %v3127_v40  ;;  %3915 = vmatprep.mubr.f32.mxu1 %v5173_v36 }
  0xd1   : > { %4111 = vmatpush3.msra.mxu0 %v3127_v40  ;;  %3916 = vmatmul.mubr.f32.gmra.mxu1 %v5180_v38 }
  0xd2   : > { %3995 = vmatprep.mubr.f32.mxu0 %v5189_v41  ;;  %4032 = vmatprep.subr.mxu1 %v3110_v43 }
  0xd3   : > { %3996 = vmatmul.mubr.f32.gmra.mxu0 %v5196_v44  ;;  %4033 = vmatpush3.msra.mxu1 %v3110_v43  ;;  %v5398_v43 = vld [vmem:[%s4631_s5 + $0xb2] sm:$0xff] }
  0xd4   : > { %4112 = vmatprep.subr.mxu0 %v3126_v45  ;;  %3918 = vmatprep.mubr.f32.mxu1 %v5189_v41 }
  0xd5   : > { %4113 = vmatpush3.msra.mxu0 %v3126_v45  ;;  %3919 = vmatmul.mubr.f32.gmra.mxu1 %v5196_v44  ;;  %v3162_v45 = vld [vmem:[%s6219_s1 + $0x440] sm:$0xff] }
  0xd6   : > { %3998 = vmatprep.mubr.f32.mxu0 %v5205_v46  ;;  %4034 = vmatprep.subr.mxu1 %v3109_v16 }
  0xd7   : > { %3999 = vmatmul.mubr.f32.gmra.mxu0 %v5212_v18  ;;  %4035 = vmatpush3.msra.mxu1 %v3109_v16 }
  0xd8   : > { %4114 = vmatprep.subr.mxu0 %v3125_v23  ;;  %3921 = vmatprep.mubr.f32.mxu1 %v5205_v46 }
  0xd9   : > { %4115 = vmatpush3.msra.mxu0 %v3125_v23  ;;  %3922 = vmatmul.mubr.f32.gmra.mxu1 %v5212_v18  ;;  %v3145_v23 = vld [vmem:[%s6219_s1 + $0x2b8] sm:$0xff] }
  0xda   : > { %4001 = vmatprep.mubr.f32.mxu0 %v5221_v26  ;;  %4036 = vmatprep.subr.mxu1 %v3108_v31 }
  0xdb   : > { %4002 = vmatmul.mubr.f32.gmra.mxu0 %v5228_v34  ;;  %4037 = vmatpush3.msra.mxu1 %v3108_v31 }
  0xdc   : > { %4116 = vmatprep.subr.mxu0 %v3124_v39  ;;  %3924 = vmatprep.mubr.f32.mxu1 %v5221_v26 }
  0xdd   : > { %4117 = vmatpush3.msra.mxu0 %v3124_v39  ;;  %3925 = vmatmul.mubr.f32.gmra.mxu1 %v5228_v34  ;;  %v5420_v39 = vld [vmem:[%s4631_s5 + $0xca] sm:$0xff] }
  0xde   : > { %4004 = vmatprep.mubr.f32.mxu0 %v5237_v42  ;;  %4038 = vmatprep.subr.mxu1 %v3107_v47 }
  0xdf   : > { %4005 = vmatmul.mubr.f32.gmra.mxu0 %v5244_v48  ;;  %4039 = vmatpush3.msra.mxu1 %v3107_v47  ;;  %v3161_v47 = vld [vmem:[%s6219_s1 + $0x438] sm:$0xff] }
  0xe0   : > { %4118 = vmatprep.subr.mxu0 %v3123_v49  ;;  %3927 = vmatprep.mubr.f32.mxu1 %v5237_v42 }
  0xe1   : > { %4119 = vmatpush3.msra.mxu0 %v3123_v49  ;;  %3928 = vmatmul.mubr.f32.gmra.mxu1 %v5244_v48 }
  0xe2   : > { %4007 = vmatprep.mubr.f32.mxu0 %v5253_v50  ;;  %4040 = vmatprep.subr.mxu1 %v3106_v51 }
  0xe3   : > { %4008 = vmatmul.mubr.f32.gmra.mxu0 %v5260_v52  ;;  %4041 = vmatpush3.msra.mxu1 %v3106_v51  ;;  %v5431_v51 = vld [vmem:[%s4631_s5 + $0xda] sm:$0xff] }
  0xe4   : > { %4120 = vmatprep.subr.mxu0 %v3122_v53  ;;  %4042 = vmatprep.mubr.f32.mxu1 %v5031_v58  ;;  %v3152_v58 = vld [vmem:[%s6219_s1 + $0x2f0] sm:$0xff] }
  0xe5   : > { %4121 = vmatpush3.msra.mxu0 %v3122_v53  ;;  %4043 = vmatmul.mubr.f32.vlgmr.msra.gmra.mxu1 %v5037_v60  ;;  %v5286_v60 = vld [vmem:[%s4631_s5 + $0x22] sm:$0xff] }
  0xe6   : > { %4122 = vmatprep.mubr.f32.mxu0 %v1906_v54  ;;  %4170 = vmatprep.subr.mxu1 %v3153_v55  ;;  %v5440_v53 = vld [vmem:[%s4631_s5 + $0xe2] sm:$0xff]  ;;  %v3160_v54 = vld [vmem:[%s6219_s1 + $0x430] sm:$0xff] }
  0xe7   : > { %4123 = vmatmul.mubr.f32.vlgmr.msra.gmra.mxu0 %v1907_v56  ;;  %4171 = vmatpush3.msra.mxu1 %v3153_v55 }
  0xe8   : > { %4250 = vmatprep.subr.mxu0 %v3169_v57  ;;  %4045 = vmatprep.mubr.f32.mxu1 %v5045_v62  ;;  %v3151_v62 = vld [vmem:[%s6219_s1 + $0x2e8] sm:$0xff] }
  0xe9   : > { %4251 = vmatpush3.msra.mxu0 %v3169_v57  ;;  %4046 = vmatmul.mubr.f32.gmra.mxu1 %v5052_v0  ;;  %v5302_v0 = vld [vmem:[%s4631_s5 + $0x3a] sm:$0xff] }
  0xea   : > { %4125 = vmatprep.mubr.f32.mxu0 %v5279_v59  ;;  %4172 = vmatprep.subr.mxu1 %v3152_v58 }
  0xeb   : > { %4126 = vmatmul.mubr.f32.gmra.mxu0 %v5286_v60  ;;  %4173 = vmatpush3.msra.mxu1 %v3152_v58  ;;  %v5462_v58 = vld [vmem:[%s4631_s5 + $0xfa] sm:$0xff] }
  0xec   : > { %4252 = vmatprep.subr.mxu0 %v3168_v61  ;;  %4048 = vmatprep.mubr.f32.mxu1 %v5061_v2  ;;  %v3150_v2 = vld [vmem:[%s6219_s1 + $0x2e0] sm:$0xff] }
  0xed   : > { %4253 = vmatpush3.msra.mxu0 %v3168_v61  ;;  %4049 = vmatmul.mubr.f32.gmra.mxu1 %v5068_v4  ;;  %v5318_v4 = vld [vmem:[%s4631_s5 + $0x52] sm:$0xff]  ;;  %v3159_v61 = vld [vmem:[%s6219_s1 + $0x428] sm:$0xff] }
  0xee   : > { %4128 = vmatprep.mubr.f32.mxu0 %v5295_v63  ;;  %4174 = vmatprep.subr.mxu1 %v3151_v62 }
  0xef   : > { %4129 = vmatmul.mubr.f32.gmra.mxu0 %v5302_v0  ;;  %4175 = vmatpush3.msra.mxu1 %v3151_v62 }
  0xf0   : > { %4254 = vmatprep.subr.mxu0 %v3167_v1  ;;  %4051 = vmatprep.mubr.f32.mxu1 %v5077_v6  ;;  %v3149_v6 = vld [vmem:[%s6219_s1 + $0x2d8] sm:$0xff] }
  0xf1   : > { %4255 = vmatpush3.msra.mxu0 %v3167_v1  ;;  %4052 = vmatmul.mubr.f32.gmra.mxu1 %v5084_v8  ;;  %v5334_v8 = vld [vmem:[%s4631_s5 + $0x6a] sm:$0xff]  ;;  %v3142_v1 = vld [vmem:[%s6219_s1 + $0x2a0] sm:$0xff] }
  0xf2   : > { %4131 = vmatprep.mubr.f32.mxu0 %v5311_v3  ;;  %4176 = vmatprep.subr.mxu1 %v3150_v2 }
  0xf3   : > { %4132 = vmatmul.mubr.f32.gmra.mxu0 %v5318_v4  ;;  %4177 = vmatpush3.msra.mxu1 %v3150_v2 }
  0xf4   : > { %4256 = vmatprep.subr.mxu0 %v3166_v5  ;;  %4054 = vmatprep.mubr.f32.mxu1 %v5093_v10  ;;  %v3148_v10 = vld [vmem:[%s6219_s1 + $0x2d0] sm:$0xff] }
  0xf5   : > { %4257 = vmatpush3.msra.mxu0 %v3166_v5  ;;  %4055 = vmatmul.mubr.f32.gmra.mxu1 %v5100_v12  ;;  %v5484_v5 = vld [vmem:[%s4631_s5 + $0x112] sm:$0xff] }
  0xf6   : > { %4134 = vmatprep.mubr.f32.mxu0 %v5327_v7  ;;  %4178 = vmatprep.subr.mxu1 %v3149_v6  ;;  %v5341_v11 = vpop.f32.mrf.mxu1 }
  0xf7   : > { %4135 = vmatmul.mubr.f32.gmra.mxu0 %v5334_v8  ;;  %4179 = vmatpush3.msra.mxu1 %v3149_v6  ;;  %v5350_v12 = vpop.f32.mrf.mxu0  ;;  %v3158_v6 = vld [vmem:[%s6219_s1 + $0x420] sm:$0xff] }
  0xf8   : > { %4258 = vmatprep.subr.mxu0 %v3165_v9  ;;  %4057 = vmatprep.mubr.f32.mxu1 %v5109_v14  ;;  %v5356_v21 = vpop.f32.mrf.mxu1  ;;  %v5367_v14 = vld [vmem:[%s4631_s5 + $0x92] sm:$0xff] }
  0xf9   : > { %4259 = vmatpush3.msra.mxu0 %v3165_v9  ;;  %4058 = vmatmul.mubr.f32.gmra.mxu1 %v5116_v19  ;;  %v5362_v29 = vpop.f32.mrf.mxu0 }
  0xfa   : > { %4137 = vmatprep.mubr.f32.mxu0 %v5345_v13  ;;  %4180 = vmatprep.subr.mxu1 %v3148_v10 }
  0xfb   : > { %4138 = vmatmul.mubr.f32.gmra.mxu0 %v5354_v15  ;;  %4181 = vmatpush3.msra.mxu1 %v3148_v10  ;;  %v5372_v19 = vpop.f32.mrf.mxu1  ;;  %v5495_v10 = vld [vmem:[%s4631_s5 + $0x122] sm:$0xff] }
  0xfc   : > { %4260 = vmatprep.subr.mxu0 %v3164_v24  ;;  %4060 = vmatprep.mubr.f32.mxu1 %v5125_v22  ;;  %v5389_v22 = vld [vmem:[%s4631_s5 + $0xaa] sm:$0xff] }
  0xfd   : > { %4261 = vmatpush3.msra.mxu0 %v3164_v24  ;;  %4061 = vmatmul.mubr.f32.gmra.mxu1 %v5132_v27  ;;  %v5382_v35 = vpop.f32.mrf.mxu0  ;;  %v5384_v37 = vpop.f32.mrf.mxu1  ;;  %v3146_v27 = vld [vmem:[%s6219_s1 + $0x2c0] sm:$0xff]  ;;  %v5504_v24 = vld [vmem:[%s4631_s5 + $0x12a] sm:$0xff] }
  0xfe   : > { %4140 = vmatprep.mubr.f32.mxu0 %v5367_v14  ;;  %4182 = vmatprep.subr.mxu1 %v3147_v17 }
  0xff   : > { %4141 = vmatmul.mubr.f32.gmra.mxu0 %v5376_v25  ;;  %4183 = vmatpush3.msra.mxu1 %v3147_v17  ;;  %v5394_v40 = vpop.f32.mrf.mxu0  ;;  %v3157_v17 = vld [vmem:[%s6219_s1 + $0x418] sm:$0xff] }
 0x100   : > { %4262 = vmatprep.subr.mxu0 %v3163_v32  ;;  %4063 = vmatprep.mubr.f32.mxu1 %v5141_v30  ;;  %v5409_v30 = vld [vmem:[%s4631_s5 + $0xc2] sm:$0xff] }
 0x101   : > { %4263 = vmatpush3.msra.mxu0 %v3163_v32  ;;  %4064 = vmatmul.mubr.f32.gmra.mxu1 %v5148_v20  ;;  %v5404_v16 = vpop.f32.mrf.mxu1 }
 0x102   : > { %4143 = vmatprep.mubr.f32.mxu0 %v5389_v22  ;;  %4184 = vmatprep.subr.mxu1 %v3146_v27 }
 0x103   : > { %4144 = vmatmul.mubr.f32.gmra.mxu0 %v5398_v43  ;;  %4185 = vmatpush3.msra.mxu1 %v3146_v27  ;;  %v5414_v20 = vpop.f32.mrf.mxu0  ;;  %v5416_v31 = vpop.f32.mrf.mxu1 }
 0x104   : > { %4264 = vmatprep.subr.mxu0 %v3162_v45  ;;  %4066 = vmatprep.mubr.f32.mxu1 %v5157_v28  ;;  %v3144_v28 = vld [vmem:[%s6219_s1 + $0x2b0] sm:$0xff] }
 0x105   : > { %4265 = vmatpush3.msra.mxu0 %v3162_v45  ;;  %4067 = vmatmul.mubr.f32.gmra.mxu1 %v5164_v33  ;;  %v5426_v49 = vpop.f32.mrf.mxu0 }
 0x106   : > { %4146 = vmatprep.mubr.f32.mxu0 %v5409_v30  ;;  %4186 = vmatprep.subr.mxu1 %v3145_v23 }
 0x107   : > { %4147 = vmatmul.mubr.f32.gmra.mxu0 %v5420_v39  ;;  %4187 = vmatpush3.msra.mxu1 %v3145_v23  ;;  %v5436_v33 = vpop.f32.mrf.mxu1  ;;  %v5526_v23 = vld [vmem:[%s4631_s5 + $0x142] sm:$0xff] }
 0x108   : > { %4266 = vmatprep.subr.mxu0 %v3161_v47  ;;  %4069 = vmatprep.mubr.f32.mxu1 %v5173_v36  ;;  %v5453_v36 = vld [vmem:[%s4631_s5 + $0xf2] sm:$0xff] }
 0x109   : > { %4267 = vmatpush3.msra.mxu0 %v3161_v47  ;;  %4070 = vmatmul.mubr.f32.gmra.mxu1 %v5180_v38  ;;  %v5446_v55 = vpop.f32.mrf.mxu0  ;;  %v5448_v56 = vpop.f32.mrf.mxu1  ;;  %v3143_v38 = vld [vmem:[%s6219_s1 + $0x2a8] sm:$0xff]  ;;  %v3156_v47 = vld [vmem:[%s6219_s1 + $0x410] sm:$0xff] }
 0x10a   : > { %4149 = vmatprep.mubr.f32.mxu0 %v5431_v51  ;;  %4188 = vmatprep.subr.mxu1 %v3144_v28 }
 0x10b   : > { %4150 = vmatmul.mubr.f32.gmra.mxu0 %v5440_v53  ;;  %4189 = vmatpush3.msra.mxu1 %v3144_v28  ;;  %v5458_v57 = vpop.f32.mrf.mxu0 }
 0x10c   : > { %4268 = vmatprep.subr.mxu0 %v3160_v54  ;;  %4072 = vmatprep.mubr.f32.mxu1 %v5189_v41  ;;  %v5473_v41 = vld [vmem:[%s4631_s5 + $0x10a] sm:$0xff] }
 0x10d   : > { %4269 = vmatpush3.msra.mxu0 %v3160_v54  ;;  %4073 = vmatmul.mubr.f32.gmra.mxu1 %v5196_v44  ;;  %v5468_v62 = vpop.f32.mrf.mxu1 }
 0x10e   : > { %4152 = vmatprep.mubr.f32.mxu0 %v5453_v36  ;;  %4190 = vmatprep.subr.mxu1 %v3143_v38 }
 0x10f   : > { %4153 = vmatmul.mubr.f32.gmra.mxu0 %v5462_v58  ;;  %4191 = vmatpush3.msra.mxu1 %v3143_v38  ;;  %v5478_v44 = vpop.f32.mrf.mxu0  ;;  %v5480_v2 = vpop.f32.mrf.mxu1 }
 0x110   : > { %4270 = vmatprep.subr.mxu0 %v3159_v61  ;;  %4075 = vmatprep.mubr.f32.mxu1 %v5205_v46  ;;  %v3141_v46 = vld [vmem:[%s6219_s1 + $0x298] sm:$0xff] }
 0x111   : > { %4271 = vmatpush3.msra.mxu0 %v3159_v61  ;;  %4076 = vmatmul.mubr.f32.gmra.mxu1 %v5212_v18  ;;  %v5490_v9 = vpop.f32.mrf.mxu0  ;;  %v5548_v61 = vld [vmem:[%s4631_s5 + $0x15a] sm:$0xff] }
 0x112   : > { %4155 = vmatprep.mubr.f32.mxu0 %v5473_v41  ;;  %4192 = vmatprep.subr.mxu1 %v3142_v1 }
 0x113   : > { %4156 = vmatmul.mubr.f32.gmra.mxu0 %v5484_v5  ;;  %4193 = vmatpush3.msra.mxu1 %v3142_v1  ;;  %v5500_v18 = vpop.f32.mrf.mxu1  ;;  %v3155_v1 = vld [vmem:[%s6219_s1 + $0x408] sm:$0xff] }
 0x114   : > { %4272 = vmatprep.subr.mxu0 %v3158_v6  ;;  %4078 = vmatprep.mubr.f32.mxu1 %v5221_v26  ;;  %v5517_v26 = vld [vmem:[%s4631_s5 + $0x13a] sm:$0xff] }
 0x115   : > { %4273 = vmatpush3.msra.mxu0 %v3158_v6  ;;  %4079 = vmatmul.mubr.f32.gmra.mxu1 %v5228_v34  ;;  %v5510_v32 = vpop.f32.mrf.mxu0  ;;  %v5512_v27 = vpop.f32.mrf.mxu1  ;;  %v3140_v34 = vld [vmem:[%s6219_s1 + $0x290] sm:$0xff] }
 0x116   : > { %6225 = vst [vmem:[#allocation5_spill] sm:$0xff] %v5512_v27  ;;  %4158 = vmatprep.mubr.f32.mxu0 %v5495_v10  ;;  %4194 = vmatprep.subr.mxu1 %v3141_v46 }
 0x117   : > { %4159 = vmatmul.mubr.f32.gmra.mxu0 %v5504_v24  ;;  %4195 = vmatpush3.msra.mxu1 %v3141_v46  ;;  %v5522_v45 = vpop.f32.mrf.mxu0  ;;  %v1082_v46 = vld [vmem:[%s4631_s5 + $0x199] sm:$0xff] }
 0x118   : > { %4274 = vmatprep.subr.mxu0 %v3157_v17  ;;  %4081 = vmatprep.mubr.f32.mxu1 %v5237_v42  ;;  %v5537_v42 = vld [vmem:[%s4631_s5 + $0x152] sm:$0xff] }
 0x119   : > { %4275 = vmatpush3.msra.mxu0 %v3157_v17  ;;  %4082 = vmatmul.mubr.f32.gmra.mxu1 %v5244_v48  ;;  %v5532_v28 = vpop.f32.mrf.mxu1  ;;  %v3139_v48 = vld [vmem:[%s6219_s1 + $0x288] sm:$0xff] }
 0x11a   : > { %6226 = vst [vmem:[#allocation6_spill] sm:$0xff] %v5532_v28  ;;  %4161 = vmatprep.mubr.f32.mxu0 %v5517_v26  ;;  %4196 = vmatprep.subr.mxu1 %v3140_v34  ;;  %v1083_v17 = vld [vmem:[%s4631_s5 + $0x1a1] sm:$0xff] }
 0x11b   : > { %4162 = vmatmul.mubr.f32.gmra.mxu0 %v5526_v23  ;;  %4197 = vmatpush3.msra.mxu1 %v3140_v34  ;;  %v5542_v54 = vpop.f32.mrf.mxu0  ;;  %v5544_v38 = vpop.f32.mrf.mxu1  ;;  %v5563_v34 = vld [vmem:[%s4631_s5 + $0x16a] sm:$0xff] }
 0x11c   : > { %6227 = vst [vmem:[#allocation7_spill] sm:$0xff] %v5544_v38  ;;  %4276 = vmatprep.subr.mxu0 %v3156_v47  ;;  %4084 = vmatprep.mubr.f32.mxu1 %v5253_v50 }
 0x11d   : > { %4277 = vmatpush3.msra.mxu0 %v3156_v47  ;;  %4085 = vmatmul.mubr.f32.gmra.mxu1 %v5260_v52  ;;  %v5554_v6 = vpop.f32.mrf.mxu0  ;;  %v3138_v52 = vld [vmem:[%s6219_s1 + $0x280] sm:$0xff]  ;;  %v5569_v47 = vld [vmem:[%s4631_s5 + $0x172] sm:$0xff] }
 0x11e   : > { %4164 = vmatprep.mubr.f32.mxu0 %v5537_v42  ;;  %4198 = vmatprep.subr.mxu1 %v3139_v48 }
 0x11f   : > { %4165 = vmatmul.mubr.f32.gmra.mxu0 %v5548_v61  ;;  %4199 = vmatpush3.msra.mxu1 %v3139_v48  ;;  %v5560_v50 = vpop.f32.mrf.mxu1  ;;  %v3154_v48 = vld [vmem:[%s6219_s1 + $0x400] sm:$0xff] }
 0x120   : > { %6228 = vst [vmem:[#allocation8_spill] sm:$0xff] %v5560_v50  ;;  %4278 = vmatprep.subr.mxu0 %v3155_v1  ;;  %4087 = vmatprep.mubr.f32.mxu1 %v1082_v46 }
 0x121   : > { %4279 = vmatpush3.msra.mxu0 %v3155_v1  ;;  %4088 = vmatmul.mubr.f32.gmra.mxu1 %v1083_v17  ;;  %v5571_v38 = vpop.f32.mrf.mxu0  ;;  %v5573_v28 = vpop.f32.mrf.mxu1 }
 0x122   : > { %6229 = vst [vmem:[#allocation9_spill] sm:$0xff] %v5573_v28  ;;  %4167 = vmatprep.mubr.f32.mxu0 %v5563_v34  ;;  %4200 = vmatprep.subr.mxu1 %v3138_v52 }
 0x123   : > { %4168 = vmatmul.mubr.f32.gmra.mxu0 %v5569_v47  ;;  %4201 = vmatpush3.msra.mxu1 %v3138_v52  ;;  %v5580_v50 = vpop.f32.mrf.mxu0 }
 0x124   : > { %4280 = vmatprep.subr.mxu0 %v3154_v48  ;;  %4202 = vmatprep.mubr.f32.mxu1 %v5279_v59 }
 0x125   : > { %4281 = vmatpush3.msra.mxu0 %v3154_v48  ;;  %v3724_v1 = vpop.f32.mrf.mxu1  ;;  %4203 = vmatmul.mubr.f32.vlgmr.msra.gmra.mxu1 %v5286_v60 }
 0x126   : > { %v621_v46 = vadd.f32 %v3724_v1, %v5350_v12  ;;  %4282 = vmatprep.mubr.f32.mxu0 %v5295_v63  ;;  %4205 = vmatprep.mubr.f32.mxu1 %v5295_v63 }
 0x127   : > { %v3804_v17 = vpop.f32.mrf.mxu0  ;;  %4283 = vmatmul.mubr.f32.vlgmr.msra.gmra.mxu0 %v5302_v0  ;;  %v615_v28 = vpop.f32.mrf.mxu1 }
 0x128   : > { %v5588_v52 = vadd.f32 %v3804_v17, %v621_v46  ;;  %v616_v27 = vadd.f32 %v615_v28, %v5362_v29  ;;  %4285 = vmatprep.mubr.f32.mxu0 %v5311_v3 }
 0x129   : > { %v857_v59 = vpop.f32.mrf.mxu0  ;;  %v3727_v48 = vpop.f32.mrf.mxu1  ;;  %4206 = vmatmul.mubr.f32.gmra.mxu1 %v5302_v0 }
 0x12a   : > { %v5593_v60 = vadd.f32 %v857_v59, %v616_v27  ;;  %v631_v12 = vadd.f32 %v3727_v48, %v5382_v35  ;;  %4208 = vmatprep.mubr.f32.mxu1 %v5311_v3 }
 0x12b   : > { %v3807_v63 = vpop.f32.mrf.mxu0  ;;  %4286 = vmatmul.mubr.f32.gmra.mxu0 %v5318_v4  ;;  %v625_v1 = vpop.f32.mrf.mxu1 }
 0x12c   : > { %v5598_v46 = vadd.f32 %v3807_v63, %v631_v12  ;;  %v626_v29 = vadd.f32 %v625_v1, %v5394_v40  ;;  %4288 = vmatprep.mubr.f32.mxu0 %v5327_v7 }
 0x12d   : > { %v867_v28 = vpop.f32.mrf.mxu0  ;;  %v3730_v17 = vpop.f32.mrf.mxu1  ;;  %4209 = vmatmul.mubr.f32.gmra.mxu1 %v5318_v4 }
 0x12e   : > { %v5603_v0 = vadd.f32 %v867_v28, %v626_v29  ;;  %v641_v35 = vadd.f32 %v3730_v17, %v5414_v20  ;;  %4211 = vmatprep.mubr.f32.mxu1 %v5327_v7 }
 0x12f   : > { %v3810_v3 = vpop.f32.mrf.mxu0  ;;  %4289 = vmatmul.mubr.f32.gmra.mxu0 %v5334_v8  ;;  %v635_v27 = vpop.f32.mrf.mxu1 }
 0x130   : > { %v5608_v59 = vadd.f32 %v3810_v3, %v641_v35  ;;  %v636_v40 = vadd.f32 %v635_v27, %v5426_v49  ;;  %4291 = vmatprep.mubr.f32.mxu0 %v5345_v13 }
 0x131   : > { %v877_v48 = vpop.f32.mrf.mxu0  ;;  %v3733_v12 = vpop.f32.mrf.mxu1  ;;  %4212 = vmatmul.mubr.f32.gmra.mxu1 %v5334_v8 }
 0x132   : > { %v5613_v4 = vadd.f32 %v877_v48, %v636_v40  ;;  %v651_v20 = vadd.f32 %v3733_v12, %v5446_v55  ;;  %4214 = vmatprep.mubr.f32.mxu1 %v5345_v13 }
 0x133   : > { %v3813_v7 = vpop.f32.mrf.mxu0  ;;  %4292 = vmatmul.mubr.f32.gmra.mxu0 %v5354_v15  ;;  %v645_v63 = vpop.f32.mrf.mxu1 }
 0x134   : > { %v5618_v1 = vadd.f32 %v3813_v7, %v651_v20  ;;  %v646_v49 = vadd.f32 %v645_v63, %v5458_v57  ;;  %4294 = vmatprep.mubr.f32.mxu0 %v5367_v14 }
 0x135   : > { %v887_v29 = vpop.f32.mrf.mxu0  ;;  %v3736_v28 = vpop.f32.mrf.mxu1  ;;  %4215 = vmatmul.mubr.f32.gmra.mxu1 %v5354_v15 }
 0x136   : > { %v5623_v8 = vadd.f32 %v887_v29, %v646_v49  ;;  %v661_v55 = vadd.f32 %v3736_v28, %v5478_v44  ;;  %4217 = vmatprep.mubr.f32.mxu1 %v5367_v14 }
 0x137   : > { %v3816_v13 = vpop.f32.mrf.mxu0  ;;  %4295 = vmatmul.mubr.f32.gmra.mxu0 %v5376_v25  ;;  %v655_v17 = vpop.f32.mrf.mxu1 }
 0x138   : > { %v5628_v35 = vadd.f32 %v3816_v13, %v661_v55  ;;  %v656_v57 = vadd.f32 %v655_v17, %v5490_v9  ;;  %4297 = vmatprep.mubr.f32.mxu0 %v5389_v22 }
 0x139   : > { %v897_v3 = vpop.f32.mrf.mxu0  ;;  %v3739_v27 = vpop.f32.mrf.mxu1  ;;  %4218 = vmatmul.mubr.f32.gmra.mxu1 %v5376_v25 }
 0x13a   : > { %v5633_v15 = vadd.f32 %v897_v3, %v656_v57  ;;  %v671_v44 = vadd.f32 %v3739_v27, %v5510_v32  ;;  %4220 = vmatprep.mubr.f32.mxu1 %v5389_v22 }
 0x13b   : > { %v3819_v14 = vpop.f32.mrf.mxu0  ;;  %4298 = vmatmul.mubr.f32.gmra.mxu0 %v5398_v43  ;;  %v665_v40 = vpop.f32.mrf.mxu1 }
 0x13c   : > { %v5638_v48 = vadd.f32 %v3819_v14, %v671_v44  ;;  %v666_v9 = vadd.f32 %v665_v40, %v5522_v45  ;;  %4300 = vmatprep.mubr.f32.mxu0 %v5409_v30 }
 0x13d   : > { %v907_v12 = vpop.f32.mrf.mxu0  ;;  %v3742_v20 = vpop.f32.mrf.mxu1  ;;  %4221 = vmatmul.mubr.f32.gmra.mxu1 %v5398_v43 }
 0x13e   : > { %v5643_v25 = vadd.f32 %v907_v12, %v666_v9  ;;  %v681_v32 = vadd.f32 %v3742_v20, %v5542_v54  ;;  %4223 = vmatprep.mubr.f32.mxu1 %v5409_v30 }
 0x13f   : > { %v3822_v22 = vpop.f32.mrf.mxu0  ;;  %4301 = vmatmul.mubr.f32.gmra.mxu0 %v5420_v39  ;;  %v675_v7 = vpop.f32.mrf.mxu1 }
 0x140   : > { %v5648_v63 = vadd.f32 %v3822_v22, %v681_v32  ;;  %v676_v45 = vadd.f32 %v675_v7, %v5554_v6  ;;  %4303 = vmatprep.mubr.f32.mxu0 %v5431_v51 }
 0x141   : > { %v917_v49 = vpop.f32.mrf.mxu0  ;;  %v3745_v29 = vpop.f32.mrf.mxu1  ;;  %4224 = vmatmul.mubr.f32.gmra.mxu1 %v5420_v39 }
 0x142   : > { %v5653_v43 = vadd.f32 %v917_v49, %v676_v45  ;;  %v691_v54 = vadd.f32 %v3745_v29, %v5571_v38  ;;  %4226 = vmatprep.mubr.f32.mxu1 %v5431_v51 }
 0x143   : > { %v3825_v30 = vpop.f32.mrf.mxu0  ;;  %4304 = vmatmul.mubr.f32.gmra.mxu0 %v5440_v53  ;;  %v685_v28 = vpop.f32.mrf.mxu1 }
 0x144   : > { %v5658_v55 = vadd.f32 %v3825_v30, %v691_v54  ;;  %v686_v6 = vadd.f32 %v685_v28, %v5580_v50  ;;  %4306 = vmatprep.mubr.f32.mxu0 %v5453_v36 }
 0x145   : > { %v927_v13 = vpop.f32.mrf.mxu0  ;;  %v3748_v17 = vpop.f32.mrf.mxu1  ;;  %4227 = vmatmul.mubr.f32.gmra.mxu1 %v5440_v53 }
 0x146   : > { %v5663_v39 = vadd.f32 %v927_v13, %v686_v6  ;;  %v701_v38 = vadd.f32 %v3748_v17, %v5341_v11  ;;  %4229 = vmatprep.mubr.f32.mxu1 %v5453_v36 }
 0x147   : > { %v3828_v51 = vpop.f32.mrf.mxu0  ;;  %4307 = vmatmul.mubr.f32.gmra.mxu0 %v5462_v58  ;;  %v695_v57 = vpop.f32.mrf.mxu1 }
 0x148   : > { %v5668_v3 = vadd.f32 %v3828_v51, %v701_v38  ;;  %v696_v50 = vadd.f32 %v695_v57, %v5356_v21  ;;  %4309 = vmatprep.mubr.f32.mxu0 %v5473_v41 }
 0x149   : > { %v937_v27 = vpop.f32.mrf.mxu0  ;;  %v3751_v44 = vpop.f32.mrf.mxu1  ;;  %4230 = vmatmul.mubr.f32.gmra.mxu1 %v5462_v58 }
 0x14a   : > { %v5673_v53 = vadd.f32 %v937_v27, %v696_v50  ;;  %v711_v11 = vadd.f32 %v3751_v44, %v5372_v19  ;;  %4232 = vmatprep.mubr.f32.mxu1 %v5473_v41  ;;  %v1939_v50 = vld [vmem:[%s4631_s5 + $0x18a] sm:$0xff]  ;;  %v1940_v44 = vld [vmem:[%s4631_s5 + $0x19a] sm:$0xff] }
 0x14b   : > { %v3831_v36 = vpop.f32.mrf.mxu0  ;;  %4310 = vmatmul.mubr.f32.gmra.mxu0 %v5484_v5  ;;  %v705_v14 = vpop.f32.mrf.mxu1 }
 0x14c   : > { %v5678_v40 = vadd.f32 %v3831_v36, %v711_v11  ;;  %v706_v21 = vadd.f32 %v705_v14, %v5384_v37  ;;  %4312 = vmatprep.mubr.f32.mxu0 %v5495_v10 }
 0x14d   : > { %v947_v9 = vpop.f32.mrf.mxu0  ;;  %v3754_v12 = vpop.f32.mrf.mxu1  ;;  %4233 = vmatmul.mubr.f32.gmra.mxu1 %v5484_v5 }
 0x14e   : > { %v5683_v58 = vadd.f32 %v947_v9, %v706_v21  ;;  %v721_v19 = vadd.f32 %v3754_v12, %v5404_v16  ;;  %4235 = vmatprep.mubr.f32.mxu1 %v5495_v10  ;;  %v6232_v9 = vld [vmem:[#allocation7_spill] sm:$0xff] }
 0x14f   : > { %v3834_v41 = vpop.f32.mrf.mxu0  ;;  %4313 = vmatmul.mubr.f32.gmra.mxu0 %v5504_v24  ;;  %v715_v20 = vpop.f32.mrf.mxu1 }
 0x150   : > { %v5688_v32 = vadd.f32 %v3834_v41, %v721_v19  ;;  %v716_v37 = vadd.f32 %v715_v20, %v5416_v31  ;;  %4315 = vmatprep.mubr.f32.mxu0 %v5517_v26  ;;  %v1941_v19 = vld [vmem:[%s4631_s5 + $0x1a2] sm:$0xff] }
 0x151   : > { %v957_v22 = vpop.f32.mrf.mxu0  ;;  %v3757_v7 = vpop.f32.mrf.mxu1  ;;  %4236 = vmatmul.mubr.f32.gmra.mxu1 %v5504_v24 }
 0x152   : > { %v5693_v5 = vadd.f32 %v957_v22, %v716_v37  ;;  %v731_v16 = vadd.f32 %v3757_v7, %v5436_v33  ;;  %4238 = vmatprep.mubr.f32.mxu1 %v5517_v26 }
 0x153   : > { %v3837_v10 = vpop.f32.mrf.mxu0  ;;  %4316 = vmatmul.mubr.f32.gmra.mxu0 %v5526_v23  ;;  %v725_v45 = vpop.f32.mrf.mxu1 }
 0x154   : > { %v5698_v49 = vadd.f32 %v3837_v10, %v731_v16  ;;  %v726_v31 = vadd.f32 %v725_v45, %v5448_v56  ;;  %4318 = vmatprep.mubr.f32.mxu0 %v5537_v42  ;;  %v6234_v45 = vld [vmem:[#allocation9_spill] sm:$0xff] }
 0x155   : > { %v967_v29 = vpop.f32.mrf.mxu0  ;;  %v3760_v54 = vpop.f32.mrf.mxu1  ;;  %4239 = vmatmul.mubr.f32.gmra.mxu1 %v5526_v23  ;;  %v1938_v23 = vld [vmem:[%s4631_s5 + $0x182] sm:$0xff]  ;;  %s237_s5 = sand.u32 1, %s4480_s16  }
 0x156   : > { %v5703_v24 = vadd.f32 %v967_v29, %v726_v31  ;;  %v741_v33 = vadd.f32 %v3760_v54, %v5468_v62  ;;  %4241 = vmatprep.mubr.f32.mxu1 %v5537_v42  ;;  %s3040_s13 = sshll.u32 %s237_s5, 8  ;;  %s6173_s18 = scalar_lea.sflag [#allocation3], %s237_s5 }
 0x157   : > { %v3840_v26 = vpop.f32.mrf.mxu0  ;;  %4319 = vmatmul.mubr.f32.gmra.mxu0 %v5548_v61  ;;  %v735_v30 = vpop.f32.mrf.mxu1  ;;  %s5998_s14 = scalar_lea.vmem [#allocation2], %s3040_s13 }
 0x158   : > { %v5708_v28 = vadd.f32 %v3840_v26, %v741_v33  ;;  %v736_v56 = vadd.f32 %v735_v30, %v5480_v2  ;;  %4321 = vmatprep.mubr.f32.mxu0 %v5563_v34  ;;  %v6230_v2 = vld [vmem:[#allocation5_spill] sm:$0xff]  ;;  %s2921_s22 = sshll.u32 %s5998_s14, 4  ;;  %s6167_s22 = int_to_ptr.vmem [resolvable:$true] %s2921_s22 }
 0x159   : > { %v977_v6 = vpop.f32.mrf.mxu0  ;;  %v3763_v13 = vpop.f32.mrf.mxu1  ;;  %4242 = vmatmul.mubr.f32.gmra.mxu1 %v5548_v61  ;;  %s4420_s30 = scalar_lea.vmem %s6167_s22, 4096  ;;  %p4427_p1 = scmp.lt.s32.totalorder %s6167_s22, %s4425_s7 }
 0x15a   : > { %v5714_v62 = vadd.f32 %v977_v6, %v736_v56  ;;  %v751_v42 = vadd.f32 %v3763_v13, %v5500_v18  ;;  %4244 = vmatprep.mubr.f32.mxu1 %v5563_v34  ;;  %v6231_v18 = vld [vmem:[#allocation6_spill] sm:$0xff]  ;;  %p4421_p12 = scmp.ne.s32.totalorder %s6167_s22, %s4420_s30  ;;  %p4428_p2 = scmp.lt.s32.totalorder %s4426_s8, %s4420_s30 }
 0x15b   : > { %v3843_v17 = vpop.f32.mrf.mxu0  ;;  %4322 = vmatmul.mubr.f32.gmra.mxu0 %v5569_v47  ;;  %v745_v38 = vpop.f32.mrf.mxu1 }
 0x15c   : > { %v5719_v51 = vadd.f32 %v3843_v17, %v751_v42  ;;  %v746_v57 = vadd.f32 %v745_v38, %v6230_v2  ;;  %4324 = vmatprep.mubr.f32.mxu0 %v1938_v23  ;;  %p4422_p13 = pnand %p4421_p12, %p4566_p4  ;;  %p4429_p3 = por %p4428_p2, %p4427_p1 }
 0x15d   : > { %v987_v27 = vpop.f32.mrf.mxu0  ;;  %v3766_v61 = vpop.f32.mrf.mxu1  ;;  %4245 = vmatmul.mubr.f32.gmra.mxu1 %v5569_v47  ;;  %v6233_v47 = vld [vmem:[#allocation8_spill] sm:$0xff] }
 0x15e   : > { %v5725_v11 = vadd.f32 %v987_v27, %v746_v57  ;;  %v761_v34 = vadd.f32 %v3766_v61, %v6231_v18  ;;  %4247 = vmatprep.mubr.f32.mxu1 %v1938_v23  ;;  %p4423_p0 = pneg %p4422_p13 }
 0x15f   : > { %v3846_v36 = vpop.f32.mrf.mxu0  ;;  %4325 = vmatmul.mubr.f32.gmra.mxu0 %v1939_v50  ;;  %v755_v14 = vpop.f32.mrf.mxu1 }
 0x160   : > { %v5728_v21 = vadd.f32 %v3846_v36, %v761_v34  ;;  %v756_v12 = vadd.f32 %v755_v14, %v6232_v9  ;;  %4327 = vmatprep.mubr.f32.mxu0 %v1940_v44  ;;  %p4430_p5 = pnand %p4429_p3, %p4423_p0 }
 0x161   : > { %v997_v41 = vpop.f32.mrf.mxu0  ;;  %v3769_v20 = vpop.f32.mrf.mxu1  ;;  %4248 = vmatmul.mubr.f32.gmra.mxu1 %v1939_v50 }
 0x162   : > { %v5732_v37 = vadd.f32 %v997_v41, %v756_v12  ;;  %v771_v22 = vadd.f32 %v3769_v20, %v6233_v47 }
 0x163   : > { %v3849_v7 = vpop.f32.mrf.mxu0  ;;  %4328 = vmatmul.mubr.f32.gmra.mxu0 %v1941_v19  ;;  %v765_v16 = vpop.f32.mrf.mxu1 }
 0x164   : > { %v5735_v10 = vadd.f32 %v3849_v7, %v771_v22  ;;  %v766_v31 = vadd.f32 %v765_v16, %v6234_v45 }
 0x165   : > { %v1007_v29 = vpop.f32.mrf.mxu0  ;;  %v3884_v54 = vpop.f32.mrf.mxu1 }
 0x166   : > { %v5738_v33 = vadd.f32 %v1007_v29, %v766_v31  ;;  %v1327_v26 = vadd.f32 %v3884_v54, %v5588_v52 }
 0x167   : > { %v3964_v30 = vpop.f32.mrf.mxu0  ;;  %v1167_v56 = vpop.f32.mrf.mxu1 }
 0x168   : > { %v5741_v6 = vadd.f32 %v3964_v30, %v1327_v26  ;;  %v1326_v13 = vadd.f32 %v1167_v56, %v5593_v60 }
 0x169   : > { %v1441_v23 = vpop.f32.mrf.mxu0  ;;  %v3887_v42 = vpop.f32.mrf.mxu1 }
 0x16a   : > { %v5744_v17 = vadd.f32 %v1441_v23, %v1326_v13  ;;  %v1329_v38 = vadd.f32 %v3887_v42, %v5598_v46 }
 0x16b   : > { %v3967_v2 = vpop.f32.mrf.mxu0  ;;  %v1177_v57 = vpop.f32.mrf.mxu1 }
 0x16c   : > { %v5747_v50 = vadd.f32 %v3967_v2, %v1329_v38  ;;  %v1328_v27 = vadd.f32 %v1177_v57, %v5603_v0 }
 0x16d   : > { %v1451_v61 = vpop.f32.mrf.mxu0  ;;  %v3890_v52 = vpop.f32.mrf.mxu1 }
 0x16e   : > { %v5750_v44 = vadd.f32 %v1451_v61, %v1328_v27  ;;  %v1331_v18 = vadd.f32 %v3890_v52, %v5608_v59 }
 0x16f   : > { %v3970_v34 = vpop.f32.mrf.mxu0  ;;  %v1187_v60 = vpop.f32.mrf.mxu1 }
 0x170   : > { %v5753_v36 = vadd.f32 %v3970_v34, %v1331_v18  ;;  %v1330_v14 = vadd.f32 %v1187_v60, %v5613_v4 }
 0x171   : > { %v1461_v9 = vpop.f32.mrf.mxu0  ;;  %v3893_v46 = vpop.f32.mrf.mxu1 }
 0x172   : > { %v5756_v12 = vadd.f32 %v1461_v9, %v1330_v14  ;;  %v1333_v19 = vadd.f32 %v3893_v46, %v5618_v1 }
 0x173   : > { %v3973_v41 = vpop.f32.mrf.mxu0  ;;  %v1197_v0 = vpop.f32.mrf.mxu1 }
 0x174   : > { %v5759_v20 = vadd.f32 %v3973_v41, %v1333_v19  ;;  %v1332_v47 = vadd.f32 %v1197_v0, %v5623_v8 }
 0x175   : > { %v1471_v22 = vpop.f32.mrf.mxu0  ;;  %v3896_v59 = vpop.f32.mrf.mxu1 }
 0x176   : > { %v5762_v7 = vadd.f32 %v1471_v22, %v1332_v47  ;;  %v1335_v16 = vadd.f32 %v3896_v59, %v5628_v35 }
 0x177   : > { %v3976_v45 = vpop.f32.mrf.mxu0  ;;  %v1207_v4 = vpop.f32.mrf.mxu1 }
 0x178   : > { %v5765_v31 = vadd.f32 %v3976_v45, %v1335_v16  ;;  %v1334_v29 = vadd.f32 %v1207_v4, %v5633_v15 }
 0x179   : > { %v1481_v54 = vpop.f32.mrf.mxu0  ;;  %v3899_v1 = vpop.f32.mrf.mxu1 }
 0x17a   : > { %v5768_v26 = vadd.f32 %v1481_v54, %v1334_v29  ;;  %v1337_v30 = vadd.f32 %v3899_v1, %v5638_v48 }
 0x17b   : > { %v3979_v56 = vpop.f32.mrf.mxu0  ;;  %v1217_v8 = vpop.f32.mrf.mxu1 }
 0x17c   : > { %v5771_v13 = vadd.f32 %v3979_v56, %v1337_v30  ;;  %v1336_v23 = vadd.f32 %v1217_v8, %v5643_v25 }
 0x17d   : > { %v1491_v42 = vpop.f32.mrf.mxu0  ;;  %v3902_v35 = vpop.f32.mrf.mxu1 }
 0x17e   : > { %v5774_v38 = vadd.f32 %v1491_v42, %v1336_v23  ;;  %v1339_v2 = vadd.f32 %v3902_v35, %v5648_v63 }
 0x17f   : > { %v3982_v57 = vpop.f32.mrf.mxu0  ;;  %v1227_v15 = vpop.f32.mrf.mxu1 }
 0x180   : > { %v5777_v27 = vadd.f32 %v3982_v57, %v1339_v2  ;;  %v1338_v61 = vadd.f32 %v1227_v15, %v5653_v43 }
 0x181   : > { %v1501_v52 = vpop.f32.mrf.mxu0  ;;  %v3905_v48 = vpop.f32.mrf.mxu1 }
 0x182   : > { %v5780_v18 = vadd.f32 %v1501_v52, %v1338_v61  ;;  %v1341_v34 = vadd.f32 %v3905_v48, %v5658_v55 }
 0x183   : > { %v3985_v60 = vpop.f32.mrf.mxu0  ;;  %v1237_v25 = vpop.f32.mrf.mxu1 }
 0x184   : > { %v5783_v14 = vadd.f32 %v3985_v60, %v1341_v34  ;;  %v1340_v9 = vadd.f32 %v1237_v25, %v5663_v39 }
 0x185   : > { %v1511_v46 = vpop.f32.mrf.mxu0  ;;  %v3908_v63 = vpop.f32.mrf.mxu1 }
 0x186   : > { %v5786_v19 = vadd.f32 %v1511_v46, %v1340_v9  ;;  %v1343_v41 = vadd.f32 %v3908_v63, %v5668_v3 }
 0x187   : > { %v3988_v0 = vpop.f32.mrf.mxu0  ;;  %v1247_v43 = vpop.f32.mrf.mxu1 }
 0x188   : > { %v5789_v47 = vadd.f32 %v3988_v0, %v1343_v41  ;;  %v1342_v22 = vadd.f32 %v1247_v43, %v5673_v53 }
 0x189   : > { %v1521_v59 = vpop.f32.mrf.mxu0  ;;  %v3911_v55 = vpop.f32.mrf.mxu1 }
 0x18a   : > { %v5792_v16 = vadd.f32 %v1521_v59, %v1342_v22  ;;  %v1345_v45 = vadd.f32 %v3911_v55, %v5678_v40 }
 0x18b   : > { %v3991_v4 = vpop.f32.mrf.mxu0  ;;  %v1257_v39 = vpop.f32.mrf.mxu1 }
 0x18c   : > { %v5795_v29 = vadd.f32 %v3991_v4, %v1345_v45  ;;  %v1344_v54 = vadd.f32 %v1257_v39, %v5683_v58 }
 0x18d   : > { %v1531_v1 = vpop.f32.mrf.mxu0  ;;  %v3914_v3 = vpop.f32.mrf.mxu1 }
 0x18e   : > { %6235 = vst [vmem:[#allocation5_spill] sm:$0xff] %v5795_v29  ;;  %v5798_v30 = vadd.f32 %v1531_v1, %v1344_v54  ;;  %v1347_v56 = vadd.f32 %v3914_v3, %v5688_v32 }
 0x18f   : > { %v3994_v8 = vpop.f32.mrf.mxu0  ;;  %v1267_v53 = vpop.f32.mrf.mxu1 }
 0x190   : > { %6236 = vst [vmem:[#allocation6_spill] sm:$0xff] %v5798_v30  ;;  %v5801_v23 = vadd.f32 %v3994_v8, %v1347_v56  ;;  %v1346_v42 = vadd.f32 %v1267_v53, %v5693_v5 }
 0x191   : > { %v1541_v35 = vpop.f32.mrf.mxu0  ;;  %v3917_v40 = vpop.f32.mrf.mxu1 }
 0x192   : > { %6237 = vst [vmem:[#allocation7_spill] sm:$0xff] %v5801_v23  ;;  %v5804_v2 = vadd.f32 %v1541_v35, %v1346_v42  ;;  %v1349_v57 = vadd.f32 %v3917_v40, %v5698_v49 }
 0x193   : > { %v3997_v15 = vpop.f32.mrf.mxu0  ;;  %v1277_v58 = vpop.f32.mrf.mxu1 }
 0x194   : > { %6238 = vst [vmem:[#allocation8_spill] sm:$0xff] %v5804_v2  ;;  %v5807_v61 = vadd.f32 %v3997_v15, %v1349_v57  ;;  %v1348_v52 = vadd.f32 %v1277_v58, %v5703_v24 }
 0x195   : > { %v1551_v48 = vpop.f32.mrf.mxu0  ;;  %v3920_v32 = vpop.f32.mrf.mxu1 }
 0x196   : > { %6239 = vst [vmem:[#allocation9_spill] sm:$0xff] %v5807_v61  ;;  %v5810_v34 = vadd.f32 %v1551_v48, %v1348_v52  ;;  %v1351_v60 = vadd.f32 %v3920_v32, %v5708_v28 }
 0x197   : > { %v4000_v25 = vpop.f32.mrf.mxu0  ;;  %v1287_v5 = vpop.f32.mrf.mxu1 }
 0x198   : > { %6240 = vst [vmem:[#allocation10_spill] sm:$0xff] %v5810_v34  ;;  %v5813_v9 = vadd.f32 %v4000_v25, %v1351_v60  ;;  %v1350_v46 = vadd.f32 %v1287_v5, %v5714_v62 }
 0x199   : > { %v1561_v63 = vpop.f32.mrf.mxu0  ;;  %v3923_v49 = vpop.f32.mrf.mxu1 }
 0x19a   : > { %6241 = vst [vmem:[#allocation11_spill] sm:$0xff] %v5813_v9  ;;  %v5816_v41 = vadd.f32 %v1561_v63, %v1350_v46  ;;  %v1353_v0 = vadd.f32 %v3923_v49, %v5719_v51 }
 0x19b   : > { %v4003_v43 = vpop.f32.mrf.mxu0  ;;  %v1297_v24 = vpop.f32.mrf.mxu1 }
 0x19c   : > { %6242 = vst [vmem:[#allocation12_spill] sm:$0xff] %v5816_v41  ;;  %v5819_v22 = vadd.f32 %v4003_v43, %v1353_v0  ;;  %v1352_v59 = vadd.f32 %v1297_v24, %v5725_v11 }
 0x19d   : > { %v1571_v55 = vpop.f32.mrf.mxu0  ;;  %v3926_v28 = vpop.f32.mrf.mxu1 }
 0x19e   : > { %6243 = vst [vmem:[#allocation13_spill] sm:$0xff] %v5819_v22  ;;  %v5822_v45 = vadd.f32 %v1571_v55, %v1352_v59  ;;  %v1355_v4 = vadd.f32 %v3926_v28, %v5728_v21 }
 0x19f   : > { %v4006_v39 = vpop.f32.mrf.mxu0  ;;  %v1307_v62 = vpop.f32.mrf.mxu1 }
 0x1a0   : > { %6244 = vst [vmem:[#allocation14_spill] sm:$0xff] %v5822_v45  ;;  %v5825_v54 = vadd.f32 %v4006_v39, %v1355_v4  ;;  %v1354_v1 = vadd.f32 %v1307_v62, %v5732_v37 }
 0x1a1   : > { %v1581_v3 = vpop.f32.mrf.mxu0  ;;  %v3929_v51 = vpop.f32.mrf.mxu1 }
 0x1a2   : > { %6245 = vst [vmem:[#allocation15_spill] sm:$0xff] %v5825_v54  ;;  %v5828_v56 = vadd.f32 %v1581_v3, %v1354_v1  ;;  %v1357_v8 = vadd.f32 %v3929_v51, %v5735_v10 }
 0x1a3   : > { %v4009_v53 = vpop.f32.mrf.mxu0  ;;  %v1317_v11 = vpop.f32.mrf.mxu1 }
 0x1a4   : > { %6246 = vst [vmem:[#allocation16_spill] sm:$0xff] %v5828_v56  ;;  %v5831_v42 = vadd.f32 %v4009_v53, %v1357_v8  ;;  %v1356_v35 = vadd.f32 %v1317_v11, %v5738_v33 }
 0x1a5   : > { %v1591_v40 = vpop.f32.mrf.mxu0  ;;  %v4044_v21 = vpop.f32.mrf.mxu1 }
 0x1a6   : > { %6247 = vst [vmem:[#allocation17_spill] sm:$0xff] %v5831_v42  ;;  %v5834_v57 = vadd.f32 %v1591_v40, %v1356_v35 }
 0x1a7   : > { %v5836_v15 = vpop.f32.mrf.mxu0  ;;  %v1715_v58 = vpop.f32.mrf.mxu1 }
 0x1a8   : > { %6248 = vst [vmem:[#allocation18_spill] sm:$0xff] %v5834_v57 }
 0x1a9   : > { %v5838_v37 = vpop.f32.mrf.mxu0  ;;  %v4047_v52 = vpop.f32.mrf.mxu1 }
 0x1ab   : > { %v5840_v48 = vpop.f32.mrf.mxu0  ;;  %v5842_v32 = vpop.f32.mrf.mxu1 }
 0x1ad   : > { %v5844_v10 = vpop.f32.mrf.mxu0  ;;  %v5846_v60 = vpop.f32.mrf.mxu1 }
 0x1af   : > { %v5848_v25 = vpop.f32.mrf.mxu0  ;;  %v5850_v33 = vpop.f32.mrf.mxu1 }
 0x1b1   : > { %v5852_v5 = vpop.f32.mrf.mxu0  ;;  %v5854_v46 = vpop.f32.mrf.mxu1 }
 0x1b3   : > { %v5856_v63 = vpop.f32.mrf.mxu0  ;;  %v5858_v49 = vpop.f32.mrf.mxu1 }
 0x1b5   : > { %v5860_v0 = vpop.f32.mrf.mxu0  ;;  %v5862_v43 = vpop.f32.mrf.mxu1 }
 0x1b7   : > { %v5864_v24 = vpop.f32.mrf.mxu0  ;;  %v5866_v59 = vpop.f32.mrf.mxu1 }
 0x1b9   : > { %v5868_v55 = vpop.f32.mrf.mxu0  ;;  %v5870_v28 = vpop.f32.mrf.mxu1 }
 0x1bb   : > { %v5872_v4 = vpop.f32.mrf.mxu0  ;;  %v5874_v39 = vpop.f32.mrf.mxu1 }
 0x1bd   : > { %v5876_v62 = vpop.f32.mrf.mxu0  ;;  %v5878_v1 = vpop.f32.mrf.mxu1 }
 0x1bf   : > { %v5880_v3 = vpop.f32.mrf.mxu0  ;;  %v5882_v51 = vpop.f32.mrf.mxu1 }
 0x1c1   : > { %v5884_v8 = vpop.f32.mrf.mxu0  ;;  %v5886_v53 = vpop.f32.mrf.mxu1 }
 0x1c3   : > { %v5888_v11 = vpop.f32.mrf.mxu0  ;;  %v5890_v35 = vpop.f32.mrf.mxu1 }
 0x1c5   : > { %v5892_v40 = vpop.f32.mrf.mxu0  ;;  %v5894_v57 = vpop.f32.mrf.mxu1 }
 0x1c7   : > { %v5896_v42 = vpop.f32.mrf.mxu0  ;;  %v5898_v56 = vpop.f32.mrf.mxu1 }
 0x1c9   : > { %v5900_v54 = vpop.f32.mrf.mxu0  ;;  %v5902_v45 = vpop.f32.mrf.mxu1 }
 0x1ca   : > { %6249 = vst [vmem:[#allocation19_spill] sm:$0xff] %v5900_v54  ;;  %6250 = vst [vmem:[#allocation20_spill] sm:$0xff] %v5902_v45 }
 0x1cb   : > { %v5904_v22 = vpop.f32.mrf.mxu0  ;;  %v5906_v41 = vpop.f32.mrf.mxu1 }
 0x1cc   : > { %6251 = vst [vmem:[#allocation21_spill] sm:$0xff] %v5904_v22  ;;  %6252 = vst [vmem:[#allocation22_spill] sm:$0xff] %v5906_v41 }
 0x1cd   : > { %v5908_v9 = vpop.f32.mrf.mxu0  ;;  %v5910_v34 = vpop.f32.mrf.mxu1 }
 0x1ce   : > { %6253 = vst [vmem:[#allocation23_spill] sm:$0xff] %v5908_v9  ;;  %6254 = vst [vmem:[#allocation24_spill] sm:$0xff] %v5910_v34 }
 0x1cf   : > { %v5912_v61 = vpop.f32.mrf.mxu0  ;;  %v5914_v2 = vpop.f32.mrf.mxu1 }
 0x1d0   : > { %6255 = vst [vmem:[#allocation25_spill] sm:$0xff] %v5912_v61  ;;  %6256 = vst [vmem:[#allocation26_spill] sm:$0xff] %v5914_v2 }
 0x1d1   : > { %v5916_v23 = vpop.f32.mrf.mxu0  ;;  %v5918_v30 = vpop.f32.mrf.mxu1 }
 0x1d2   : > { %6257 = vst [vmem:[#allocation27_spill] sm:$0xff] %v5916_v23  ;;  %6258 = vst [vmem:[#allocation28_spill] sm:$0xff] %v5918_v30 }
 0x1d3   : > { %v5920_v29 = vpop.f32.mrf.mxu0  ;;  %v5922_v54 = vpop.f32.mrf.mxu1 }
 0x1d4   : > { %6259 = vst [vmem:[#allocation29_spill] sm:$0xff] %v5920_v29  ;;  %6260 = vst [vmem:[#allocation30_spill] sm:$0xff] %v5922_v54 }
 0x1d5   : > { %v5924_v45 = vpop.f32.mrf.mxu0  ;;  %v5926_v22 = vpop.f32.mrf.mxu1 }
 0x1d6   : > { %6261 = vst [vmem:[#allocation31_spill] sm:$0xff] %v5924_v45  ;;  %6262 = vst [vmem:[#allocation32_spill] sm:$0xff] %v5926_v22 }
 0x1d7   : > { %v5928_v41 = vpop.f32.mrf.mxu0  ;;  %v5930_v9 = vpop.f32.mrf.mxu1 }
 0x1d8   : > { %6263 = vst [vmem:[#allocation33_spill] sm:$0xff] %v5928_v41  ;;  %6264 = vst [vmem:[#allocation34_spill] sm:$0xff] %v5930_v9  ;;  %v1875_v41 = vadd.f32 %v4044_v21, %v5741_v6  ;;  %v1876_v6 = vadd.f32 %v5842_v32, %v5750_v44  ;;  %v5979_v44 = vld [vmem:[%s6221_s3] ss:$0 sm:$0xff] }
 0x1d9   : > { %v5932_v34 = vpop.f32.mrf.mxu0  ;;  %v5934_v61 = vpop.f32.mrf.mxu1 }
 0x1da   : > { %6265 = vst [vmem:[#allocation35_spill] sm:$0xff] %v5932_v34  ;;  %6266 = vst [vmem:[#allocation36_spill] sm:$0xff] %v5934_v61  ;;  %v1874_v61 = vadd.f32 %v1715_v58, %v5744_v17  ;;  %v5969_v58 = vld [vmem:[%s6220_s2] ss:$0 sm:$0xff]  ;;  %v2186_v32 = vadd.f32 %v5844_v10, %v1876_v6  ;;  %v1880_v6 = vadd.f32 %v5858_v49, %v5762_v7 }
 0x1db   : > { %v5936_v2 = vpop.f32.mrf.mxu0  ;;  %v5938_v23 = vpop.f32.mrf.mxu1 }
 0x1dc   : > { %6267 = vst [vmem:[#allocation37_spill] sm:$0xff] %v5936_v2  ;;  %6268 = vst [vmem:[#allocation38_spill] sm:$0xff] %v5938_v23 }
 0x1dd   : > { %v5940_v30 = vpop.f32.mrf.mxu0  ;;  %v5942_v29 = vpop.f32.mrf.mxu1 }
 0x1de   : > { %6269 = vst [vmem:[#allocation39_spill] sm:$0xff] %v5940_v30  ;;  %6270 = vst [vmem:[#allocation40_spill] sm:$0xff] %v5942_v29  ;;  %v2185_v30 = vadd.f32 %v5836_v15, %v1875_v41  ;;  %v1877_v29 = vadd.f32 %v4047_v52, %v5747_v50 }
 0x1df   : > { %v5944_v45 = vpop.f32.mrf.mxu0  ;;  %v5946_v22 = vpop.f32.mrf.mxu1 }
 0x1e0   : > { %6271 = vst [vmem:[#allocation41_spill] sm:$0xff] %v5944_v45  ;;  %6272 = vst [vmem:[#allocation42_spill] sm:$0xff] %v5946_v22  ;;  %v2184_v22 = vadd.f32 %v5838_v37, %v1874_v61  ;;  %v2187_v50 = vadd.f32 %v5840_v48, %v1877_v29  ;;  %v1879_v61 = vadd.f32 %v5846_v60, %v5753_v36 }
 0x1e1   : > { %v5949_v9 = vpop.f32.mrf.mxu0  ;;  %v5951_v34 = vpop.f32.mrf.mxu1  ;;  %v1878_v37 = vadd.f32 %v5850_v33, %v5756_v12  ;;  %v1881_v36 = vadd.f32 %v5854_v46, %v5759_v20 }
 0x1e3   : > { %v5954_v2 = vpop.f32.mrf.mxu0  ;;  %v5956_v23 = vpop.f32.mrf.mxu1  ;;  %v2188_v10 = vadd.f32 %v5852_v5, %v1878_v37 }
 0x1e5   : > { %v5960_v54 = vpop.f32.mrf.mxu0  ;;  %v4204_v45 = vpop.f32.mrf.mxu1 }
 0x1e6   : > { %6273 = vst [vmem:[#allocation43_spill] sm:$0xff] %v5960_v54  ;;  %v2459_v21 = vadd.f32 %v4204_v45, %v2185_v30  ;;  %v2189_v54 = vadd.f32 %v5848_v25, %v1879_v61 }
 0x1e7   : > { %v4284_v17 = vpop.f32.mrf.mxu0  ;;  %v2299_v41 = vpop.f32.mrf.mxu1 }
 0x1e8   : > { %v2733_v15 = vadd.f32 %v4284_v17, %v2459_v21  ;;  %v2458_v52 = vadd.f32 %v2299_v41, %v2184_v22 }
 0x1e9   : > { %v2573_v30 = vpop.f32.mrf.mxu0  ;;  %v4207_v45 = vpop.f32.mrf.mxu1 }
 0x1ea   : > { %v2772_v29 = vmul.f32 %v5969_v58, %v2733_v15  ;;  %v2732_v22 = vadd.f32 %v2573_v30, %v2458_v52  ;;  %v2461_v48 = vadd.f32 %v4207_v45, %v2187_v50  ;;  %v2191_v45 = vadd.f32 %v5856_v63, %v1881_v36 }
 0x1eb   : > { %v4287_v60 = vpop.f32.mrf.mxu0  ;;  %v2309_v12 = vpop.f32.mrf.mxu1  ;;  %v2190_v63 = vadd.f32 %v5860_v0, %v1880_v6 }
 0x1ec   : > { %v2811_v33 = vadd.f32 %v5979_v44, %v2772_v29  ;;  %v2771_v21 = vmul.f32 %v5969_v58, %v2732_v22  ;;  %v2735_v17 = vadd.f32 %v4287_v60, %v2461_v48  ;;  %v2460_v41 = vadd.f32 %v2309_v12, %v2186_v32 }
 0x1ed   : > { %v2583_v15 = vpop.f32.mrf.mxu0  ;;  %v4210_v50 = vpop.f32.mrf.mxu1  ;;  %v1883_v32 = vadd.f32 %v5862_v43, %v5765_v31 }
 0x1ee   : > { %v2843_v52 = vmax.f32 %v2811_v33, 0.0  ;;  %v2810_v20 = vadd.f32 %v5979_v44, %v2771_v21  ;;  %v2774_v46 = vmul.f32 %v5969_v58, %v2735_v17  ;;  %v2734_v30 = vadd.f32 %v2583_v15, %v2460_v41 }
 0x1ef   : > { %v2463_v29 = vadd.f32 %v4210_v50, %v2189_v54  ;;  %v4290_v25 = vpop.f32.mrf.mxu0  ;;  %v2319_v61 = vpop.f32.mrf.mxu1  ;;  %v2193_v12 = vadd.f32 %v5864_v24, %v1883_v32  ;;  %v1882_v33 = vadd.f32 %v5866_v59, %v5768_v26  ;;  %v1885_v21 = vadd.f32 %v5870_v28, %v5771_v13 }
 0x1f0   : > { %2875 = vst [vmem:[%s5998_s14 + $0x8] sm:$0xff] %v2843_v52  ;;  %v2842_v7 = vmax.f32 %v2810_v20, 0.0  ;;  %v2813_v5 = vadd.f32 %v5979_v44, %v2774_v46  ;;  %v2773_v49 = vmul.f32 %v5969_v58, %v2734_v30  ;;  %v2462_v37 = vadd.f32 %v2319_v61, %v2188_v10 }
 0x1f1   : > { %v2737_v22 = vadd.f32 %v4290_v25, %v2463_v29  ;;  %v2593_v48 = vpop.f32.mrf.mxu0  ;;  %v4213_v31 = vpop.f32.mrf.mxu1  ;;  %v1884_v52 = vadd.f32 %v5874_v39, %v5774_v38  ;;  %v2192_v30 = vadd.f32 %v5868_v55, %v1882_v33  ;;  %v1887_v38 = vadd.f32 %v5878_v1, %v5777_v27 }
 0x1f2   : > { %2874 = vst [vmem:[%s5998_s14] sm:$0xff] %v2842_v7  ;;  %v2845_v54 = vmax.f32 %v2813_v5, 0.0  ;;  %v2812_v43 = vadd.f32 %v5979_v44, %v2773_v49  ;;  %v2736_v36 = vadd.f32 %v2593_v48, %v2462_v37  ;;  %v2465_v60 = vadd.f32 %v4213_v31, %v2191_v45 }
 0x1f3   : > { %v2776_v0 = vmul.f32 %v5969_v58, %v2737_v22  ;;  %v4293_v17 = vpop.f32.mrf.mxu0  ;;  %v2329_v41 = vpop.f32.mrf.mxu1  ;;  %v2195_v45 = vadd.f32 %v5872_v4, %v1885_v21  ;;  %v2194_v49 = vadd.f32 %v5876_v62, %v1884_v52  ;;  %v1886_v55 = vadd.f32 %v5882_v51, %v5780_v18 }
 0x1f4   : > { %2877 = vst [vmem:[%s5998_s14 + $0x18] sm:$0xff] %v2845_v54  ;;  %v2844_v10 = vmax.f32 %v2812_v43, 0.0  ;;  %v2775_v6 = vmul.f32 %v5969_v58, %v2736_v36  ;;  %v2739_v15 = vadd.f32 %v4293_v17, %v2465_v60  ;;  %v2464_v50 = vadd.f32 %v2329_v41, %v2190_v63 }
 0x1f5   : > { %v2815_v24 = vadd.f32 %v5979_v44, %v2776_v0  ;;  %v2603_v20 = vpop.f32.mrf.mxu0  ;;  %v4216_v26 = vpop.f32.mrf.mxu1  ;;  %v2197_v31 = vadd.f32 %v5880_v3, %v1887_v38  ;;  %v1889_v33 = vadd.f32 %v5886_v53, %v5783_v14  ;;  %v1888_v21 = vadd.f32 %v5890_v35, %v5786_v19 }
 0x1f6   : > { %2876 = vst [vmem:[%s5998_s14 + $0x10] sm:$0xff] %v2844_v10  ;;  %v2814_v13 = vadd.f32 %v5979_v44, %v2775_v6  ;;  %v2778_v59 = vmul.f32 %v5969_v58, %v2739_v15  ;;  %v2738_v28 = vadd.f32 %v2603_v20, %v2464_v50  ;;  %v2467_v46 = vadd.f32 %v4216_v26, %v2193_v12 }
 0x1f7   : > { %v2847_v39 = vmax.f32 %v2815_v24, 0.0  ;;  %v4296_v32 = vpop.f32.mrf.mxu0  ;;  %v2339_v29 = vpop.f32.mrf.mxu1  ;;  %v2196_v12 = vadd.f32 %v5884_v8, %v1886_v55  ;;  %v1891_v50 = vadd.f32 %v5894_v57, %v5789_v47  ;;  %v2199_v20 = vadd.f32 %v5888_v11, %v1889_v33  ;;  %v6275_v11 = vld [vmem:[#allocation20_spill] sm:$0xff] }
 0x1f8   : > { %v2846_v25 = vmax.f32 %v2814_v13, 0.0  ;;  %v2817_v61 = vadd.f32 %v5979_v44, %v2778_v59  ;;  %v2777_v7 = vmul.f32 %v5969_v58, %v2738_v28  ;;  %v2741_v5 = vadd.f32 %v4296_v32, %v2467_v46 }
 0x1f9   : > { %2879 = vst [vmem:[%s5998_s14 + $0x28] sm:$0xff] %v2847_v39  ;;  %v2466_v4 = vadd.f32 %v2339_v29, %v2192_v30  ;;  %v2613_v37 = vpop.f32.mrf.mxu0  ;;  %v4219_v63 = vpop.f32.mrf.mxu1  ;;  %v2198_v26 = vadd.f32 %v5892_v40, %v1888_v21  ;;  %v1890_v47 = vadd.f32 %v5898_v56, %v5792_v16  ;;  %v2201_v38 = vadd.f32 %v5896_v42, %v1891_v50  ;;  %v6274_v39 = vld [vmem:[#allocation5_spill] sm:$0xff] }
 0x1fa   : > { %2878 = vst [vmem:[%s5998_s14 + $0x20] sm:$0xff] %v2846_v25  ;;  %v2849_v27 = vmax.f32 %v2817_v61, 0.0  ;;  %v2816_v1 = vadd.f32 %v5979_v44, %v2777_v7  ;;  %v2780_v22 = vmul.f32 %v5969_v58, %v2741_v5  ;;  %v2469_v48 = vadd.f32 %v4219_v63, %v2195_v45  ;;  %v6276_v5 = vld [vmem:[#allocation19_spill] sm:$0xff] }
 0x1fb   : > { %v2740_v54 = vadd.f32 %v2613_v37, %v2466_v4  ;;  %v4299_v43 = vpop.f32.mrf.mxu0  ;;  %v2349_v62 = vpop.f32.mrf.mxu1  ;;  %v1893_v32 = vadd.f32 %v6275_v11, %v6274_v39  ;;  %v6288_v39 = vld [vmem:[#allocation27_spill] sm:$0xff] }
 0x1fc   : > { %2881 = vst [vmem:[%s5998_s14 + $0x38] sm:$0xff] %v2849_v27  ;;  %v2848_v36 = vmax.f32 %v2816_v1, 0.0  ;;  %v2819_v18 = vadd.f32 %v5979_v44, %v2780_v22  ;;  %v2743_v51 = vadd.f32 %v4299_v43, %v2469_v48  ;;  %v2468_v60 = vadd.f32 %v2349_v62, %v2194_v49  ;;  %v6277_v22 = vld [vmem:[#allocation21_spill] sm:$0xff]  ;;  %v6280_v62 = vld [vmem:[#allocation7_spill] sm:$0xff] }
 0x1fd   : > { %v2779_v3 = vmul.f32 %v5969_v58, %v2740_v54  ;;  %v2623_v0 = vpop.f32.mrf.mxu0  ;;  %v4222_v17 = vpop.f32.mrf.mxu1  ;;  %v2200_v49 = vadd.f32 %v6276_v5, %v1890_v47  ;;  %v2203_v48 = vadd.f32 %v6277_v22, %v1893_v32  ;;  %v6279_v54 = vld [vmem:[#allocation22_spill] sm:$0xff]  ;;  %v6287_v47 = vld [vmem:[#allocation28_spill] sm:$0xff] }
 0x1fe   : > { %2880 = vst [vmem:[%s5998_s14 + $0x30] sm:$0xff] %v2848_v36  ;;  %v2851_v41 = vmax.f32 %v2819_v18, 0.0  ;;  %v2782_v10 = vmul.f32 %v5969_v58, %v2743_v51  ;;  %v2742_v6 = vadd.f32 %v2623_v0, %v2468_v60  ;;  %v2471_v15 = vadd.f32 %v4222_v17, %v2197_v31  ;;  %v6278_v31 = vld [vmem:[#allocation6_spill] sm:$0xff]  ;;  %v6281_v36 = vld [vmem:[#allocation24_spill] sm:$0xff] }
 0x1ff   : > { %v2818_v8 = vadd.f32 %v5979_v44, %v2779_v3  ;;  %v4302_v52 = vpop.f32.mrf.mxu0  ;;  %v2359_v14 = vpop.f32.mrf.mxu1  ;;  %v1892_v43 = vadd.f32 %v6279_v54, %v6278_v31  ;;  %v1895_v18 = vadd.f32 %v6281_v36, %v6280_v62  ;;  %v6282_v17 = vld [vmem:[#allocation8_spill] sm:$0xff]  ;;  %v6289_v32 = vld [vmem:[#allocation10_spill] sm:$0xff]  ;;  %v6292_v31 = vld [vmem:[#allocation31_spill] sm:$0xff] }
 0x200   : > { %2883 = vst [vmem:[%s5998_s14 + $0x48] sm:$0xff] %v2851_v41  ;;  %v2821_v19 = vadd.f32 %v5979_v44, %v2782_v10  ;;  %v2781_v53 = vmul.f32 %v5969_v58, %v2742_v6  ;;  %v2745_v35 = vadd.f32 %v4302_v52, %v2471_v15  ;;  %v2470_v24 = vadd.f32 %v2359_v14, %v2196_v12  ;;  %v6283_v41 = vld [vmem:[#allocation26_spill] sm:$0xff]  ;;  %v6294_v62 = vld [vmem:[#allocation32_spill] sm:$0xff] }
 0x201   : > { %v2850_v57 = vmax.f32 %v2818_v8, 0.0  ;;  %v2633_v13 = vpop.f32.mrf.mxu0  ;;  %v4225_v59 = vpop.f32.mrf.mxu1  ;;  %v1894_v10 = vadd.f32 %v6283_v41, %v6282_v17 }
 0x202   : > { %v2853_v28 = vmax.f32 %v2821_v19, 0.0  ;;  %v2820_v46 = vadd.f32 %v5979_v44, %v2781_v53  ;;  %v2784_v30 = vmul.f32 %v5969_v58, %v2745_v35  ;;  %v2744_v45 = vadd.f32 %v2633_v13, %v2470_v24  ;;  %v6284_v53 = vld [vmem:[#allocation23_spill] sm:$0xff]  ;;  %v6285_v24 = vld [vmem:[#allocation25_spill] sm:$0xff] }
 0x203   : > { %2882 = vst [vmem:[%s5998_s14 + $0x40] sm:$0xff] %v2850_v57  ;;  %v2473_v40 = vadd.f32 %v4225_v59, %v2199_v20  ;;  %v4305_v29 = vpop.f32.mrf.mxu0  ;;  %v2369_v25 = vpop.f32.mrf.mxu1  ;;  %v2202_v35 = vadd.f32 %v6284_v53, %v1892_v43  ;;  %v2205_v20 = vadd.f32 %v6285_v24, %v1895_v18  ;;  %v2204_v11 = vadd.f32 %v6288_v39, %v1894_v10  ;;  %v6293_v43 = vld [vmem:[#allocation11_spill] sm:$0xff]  ;;  %v6295_v18 = vld [vmem:[#allocation12_spill] sm:$0xff]  ;;  %v6297_v10 = vld [vmem:[#allocation13_spill] sm:$0xff] }
 0x204   : > { %2885 = vst [vmem:[%s5998_s14 + $0x58] sm:$0xff] %v2853_v28  ;;  %v2852_v16 = vmax.f32 %v2820_v46, 0.0  ;;  %v2823_v56 = vadd.f32 %v5979_v44, %v2784_v30  ;;  %v2783_v61 = vmul.f32 %v5969_v58, %v2744_v45  ;;  %v2472_v7 = vadd.f32 %v2369_v25, %v2198_v26  ;;  %v6286_v26 = vld [vmem:[#allocation9_spill] sm:$0xff] }
 0x205   : > { %v2747_v55 = vadd.f32 %v4305_v29, %v2473_v40  ;;  %v2643_v4 = vpop.f32.mrf.mxu0  ;;  %v4228_v42 = vpop.f32.mrf.mxu1  ;;  %v1897_v57 = vadd.f32 %v6287_v47, %v6286_v26  ;;  %v6290_v40 = vld [vmem:[#allocation30_spill] sm:$0xff]  ;;  %v1899_v36 = vadd.f32 %v6294_v62, %v6293_v43  ;;  %v6299_v24 = vld [vmem:[#allocation33_spill] sm:$0xff]  ;;  %v6300_v26 = vld [vmem:[#allocation35_spill] sm:$0xff] }
 0x206   : > { %2884 = vst [vmem:[%s5998_s14 + $0x50] sm:$0xff] %v2852_v16  ;;  %v2855_v37 = vmax.f32 %v2823_v56, 0.0  ;;  %v2822_v63 = vadd.f32 %v5979_v44, %v2783_v61  ;;  %v2746_v27 = vadd.f32 %v2643_v4, %v2472_v7  ;;  %v2475_v1 = vadd.f32 %v4228_v42, %v2201_v38  ;;  %v6307_v43 = vld [vmem:[#allocation41_spill] sm:$0xff] }
 0x207   : > { %v2786_v51 = vmul.f32 %v5969_v58, %v2747_v55  ;;  %v4308_v60 = vpop.f32.mrf.mxu0  ;;  %v2379_v12 = vpop.f32.mrf.mxu1  ;;  %v1896_v29 = vadd.f32 %v6290_v40, %v6289_v32  ;;  %v6291_v55 = vld [vmem:[#allocation29_spill] sm:$0xff] }
 0x208   : > { %2887 = vst [vmem:[%s5998_s14 + $0x68] sm:$0xff] %v2855_v37  ;;  %v2854_v33 = vmax.f32 %v2822_v63, 0.0  ;;  %v2785_v21 = vmul.f32 %v5969_v58, %v2746_v27  ;;  %v2749_v3 = vadd.f32 %v4308_v60, %v2475_v1  ;;  %v2474_v0 = vadd.f32 %v2379_v12, %v2200_v49  ;;  %v6303_v32 = vld [vmem:[#allocation37_spill] sm:$0xff] }
 0x209   : > { %v2825_v6 = vadd.f32 %v5979_v44, %v2786_v51  ;;  %v2653_v15 = vpop.f32.mrf.mxu0  ;;  %v4231_v50 = vpop.f32.mrf.mxu1  ;;  %v2207_v4 = vadd.f32 %v6291_v55, %v1897_v57  ;;  %v2206_v54 = vadd.f32 %v6292_v31, %v1896_v29  ;;  %v6296_v51 = vld [vmem:[#allocation34_spill] sm:$0xff]  ;;  %v6304_v29 = vld [vmem:[#allocation15_spill] sm:$0xff] }
 0x20a   : > { %2886 = vst [vmem:[%s5998_s14 + $0x60] sm:$0xff] %v2854_v33  ;;  %v2824_v8 = vadd.f32 %v5979_v44, %v2785_v21  ;;  %v2788_v52 = vmul.f32 %v5969_v58, %v2749_v3  ;;  %v2748_v14 = vadd.f32 %v2653_v15, %v2474_v0  ;;  %v2477_v19 = vadd.f32 %v4231_v50, %v2203_v48  ;;  %v6301_v57 = vld [vmem:[#allocation14_spill] sm:$0xff] }
 0x20b   : > { %v2857_v13 = vmax.f32 %v2825_v6, 0.0  ;;  %v4311_v59 = vpop.f32.mrf.mxu0  ;;  %v2389_v28 = vpop.f32.mrf.mxu1  ;;  %v1898_v60 = vadd.f32 %v6296_v51, %v6295_v18  ;;  %v6298_v6 = vld [vmem:[#allocation36_spill] sm:$0xff]  ;;  %v6309_v18 = vld [vmem:[#allocation42_spill] sm:$0xff] }
 0x20c   : > { %v2856_v46 = vmax.f32 %v2824_v8, 0.0  ;;  %v2827_v30 = vadd.f32 %v5979_v44, %v2788_v52  ;;  %v2787_v45 = vmul.f32 %v5969_v58, %v2748_v14  ;;  %v2751_v38 = vadd.f32 %v4311_v59, %v2477_v19 }
 0x20d   : > { %2889 = vst [vmem:[%s5998_s14 + $0x78] sm:$0xff] %v2857_v13  ;;  %v2476_v25 = vadd.f32 %v2389_v28, %v2202_v35  ;;  %v2663_v16 = vpop.f32.mrf.mxu0  ;;  %v4234_v56 = vpop.f32.mrf.mxu1  ;;  %v1901_v15 = vadd.f32 %v6298_v6, %v6297_v10  ;;  %v2208_v47 = vadd.f32 %v6300_v26, %v1898_v60  ;;  %v6302_v13 = vld [vmem:[#allocation38_spill] sm:$0xff]  ;;  %v6310_v60 = vld [vmem:[#allocation17_spill] sm:$0xff] }
 0x20e   : > { %2888 = vst [vmem:[%s5998_s14 + $0x70] sm:$0xff] %v2856_v46  ;;  %v2859_v61 = vmax.f32 %v2827_v30, 0.0  ;;  %v2826_v7 = vadd.f32 %v5979_v44, %v2787_v45  ;;  %v2790_v5 = vmul.f32 %v5969_v58, %v2751_v38  ;;  %v2479_v49 = vadd.f32 %v4234_v56, %v2205_v20  ;;  %v6311_v6 = vld [vmem:[#allocation18_spill] sm:$0xff] }
 0x20f   : > { %v2750_v42 = vadd.f32 %v2663_v16, %v2476_v25  ;;  %v4314_v37 = vpop.f32.mrf.mxu0  ;;  %v2399_v63 = vpop.f32.mrf.mxu1  ;;  %v2209_v20 = vadd.f32 %v6299_v24, %v1899_v36  ;;  %v1900_v59 = vadd.f32 %v6302_v13, %v6301_v57  ;;  %v2211_v40 = vadd.f32 %v6303_v32, %v1901_v15  ;;  %v6305_v25 = vld [vmem:[#allocation40_spill] sm:$0xff] }
 0x210   : > { %2891 = vst [vmem:[%s5998_s14 + $0x88] sm:$0xff] %v2859_v61  ;;  %v2858_v27 = vmax.f32 %v2826_v7, 0.0  ;;  %v2829_v1 = vadd.f32 %v5979_v44, %v2790_v5  ;;  %v2753_v22 = vadd.f32 %v4314_v37, %v2479_v49  ;;  %v2478_v48 = vadd.f32 %v2399_v63, %v2204_v11  ;;  %v6308_v36 = vld [vmem:[#allocation16_spill] sm:$0xff] }
 0x211   : > { %v2789_v12 = vmul.f32 %v5969_v58, %v2750_v42  ;;  %v2673_v33 = vpop.f32.mrf.mxu0  ;;  %v4237_v21 = vpop.f32.mrf.mxu1  ;;  %v1903_v16 = vadd.f32 %v6305_v25, %v6304_v29  ;;  %v6306_v42 = vld [vmem:[#allocation39_spill] sm:$0xff]  ;;  %v1902_v51 = vadd.f32 %v6309_v18, %v6308_v36  ;;  %v1904_v15 = vadd.f32 %v5956_v23, %v6311_v6 }
 0x212   : > { %2890 = vst [vmem:[%s5998_s14 + $0x80] sm:$0xff] %v2858_v27  ;;  %v2861_v3 = vmax.f32 %v2829_v1, 0.0  ;;  %v2792_v0 = vmul.f32 %v5969_v58, %v2753_v22  ;;  %v2752_v17 = vadd.f32 %v2673_v33, %v2478_v48  ;;  %v2481_v41 = vadd.f32 %v4237_v21, %v2207_v4 }
 0x213   : > { %v2828_v50 = vadd.f32 %v5979_v44, %v2789_v12  ;;  %v4317_v8 = vpop.f32.mrf.mxu0  ;;  %v2409_v52 = vpop.f32.mrf.mxu1  ;;  %v2210_v37 = vadd.f32 %v6306_v42, %v1900_v59  ;;  %v2213_v62 = vadd.f32 %v6307_v43, %v1903_v16  ;;  %v1905_v12 = vadd.f32 %v5951_v34, %v6310_v60 }
 0x214   : > { %2893 = vst [vmem:[%s5998_s14 + $0x98] sm:$0xff] %v2861_v3  ;;  %v2831_v14 = vadd.f32 %v5979_v44, %v2792_v0  ;;  %v2791_v19 = vmul.f32 %v5969_v58, %v2752_v17  ;;  %v2755_v53 = vadd.f32 %v4317_v8, %v2481_v41  ;;  %v2480_v35 = vadd.f32 %v2409_v52, %v2206_v54 }
 0x215   : > { %v2860_v28 = vmax.f32 %v2828_v50, 0.0  ;;  %v2683_v46 = vpop.f32.mrf.mxu0  ;;  %v4240_v30 = vpop.f32.mrf.mxu1  ;;  %v2215_v24 = vadd.f32 %v5954_v2, %v1905_v12 }
 0x216   : > { %v2863_v45 = vmax.f32 %v2831_v14, 0.0  ;;  %v2830_v38 = vadd.f32 %v5979_v44, %v2791_v19  ;;  %v2794_v39 = vmul.f32 %v5969_v58, %v2755_v53  ;;  %v2754_v11 = vadd.f32 %v2683_v46, %v2480_v35 }
 0x217   : > { %2892 = vst [vmem:[%s5998_s14 + $0x90] sm:$0xff] %v2860_v28  ;;  %v2483_v56 = vadd.f32 %v4240_v30, %v2209_v20  ;;  %v4320_v61 = vpop.f32.mrf.mxu0  ;;  %v2419_v7 = vpop.f32.mrf.mxu1  ;;  %v2212_v35 = vadd.f32 %v5949_v9, %v1902_v51  ;;  %v6312_v28 = vld [vmem:[#allocation43_spill] sm:$0xff] }
 0x218   : > { %2895 = vst [vmem:[%s5998_s14 + $0xa8] sm:$0xff] %v2863_v45  ;;  %v2862_v5 = vmax.f32 %v2830_v38, 0.0  ;;  %v2833_v49 = vadd.f32 %v5979_v44, %v2794_v39  ;;  %v2793_v55 = vmul.f32 %v5969_v58, %v2754_v11  ;;  %v2482_v4 = vadd.f32 %v2419_v7, %v2208_v47 }
 0x219   : > { %v2757_v63 = vadd.f32 %v4320_v61, %v2483_v56  ;;  %v2693_v27 = vpop.f32.mrf.mxu0  ;;  %v4243_v1 = vpop.f32.mrf.mxu1  ;;  %v2214_v46 = vadd.f32 %v6312_v28, %v1904_v15 }
 0x21a   : > { %2894 = vst [vmem:[%s5998_s14 + $0xa0] sm:$0xff] %v2862_v5  ;;  %v2865_v22 = vmax.f32 %v2833_v49, 0.0  ;;  %v2832_v48 = vadd.f32 %v5979_v44, %v2793_v55  ;;  %v2756_v31 = vadd.f32 %v2693_v27, %v2482_v4  ;;  %v2485_v54 = vadd.f32 %v4243_v1, %v2211_v40 }
 0x21b   : > { %v2796_v33 = vmul.f32 %v5969_v58, %v2757_v63  ;;  %v4323_v21 = vpop.f32.mrf.mxu0  ;;  %v2429_v3 = vpop.f32.mrf.mxu1 }
 0x21c   : > { %2897 = vst [vmem:[%s5998_s14 + $0xb8] sm:$0xff] %v2865_v22  ;;  %v2864_v0 = vmax.f32 %v2832_v48, 0.0  ;;  %v2795_v17 = vmul.f32 %v5969_v58, %v2756_v31  ;;  %v2759_v41 = vadd.f32 %v4323_v21, %v2485_v54  ;;  %v2484_v10 = vadd.f32 %v2429_v3, %v2210_v37 }
 0x21d   : > { %v2835_v50 = vadd.f32 %v5979_v44, %v2796_v33  ;;  %v2703_v8 = vpop.f32.mrf.mxu0  ;;  %v4246_v52 = vpop.f32.mrf.mxu1 }
 0x21e   : > { %2896 = vst [vmem:[%s5998_s14 + $0xb0] sm:$0xff] %v2864_v0  ;;  %v2834_v34 = vadd.f32 %v5979_v44, %v2795_v17  ;;  %v2798_v14 = vmul.f32 %v5969_v58, %v2759_v41  ;;  %v2758_v19 = vadd.f32 %v2703_v8, %v2484_v10  ;;  %v2487_v53 = vadd.f32 %v4246_v52, %v2213_v62 }
 0x21f   : > { %v2867_v20 = vmax.f32 %v2835_v50, 0.0  ;;  %v4326_v26 = vpop.f32.mrf.mxu0  ;;  %v2439_v23 = vpop.f32.mrf.mxu1 }
 0x220   : > { %v2866_v47 = vmax.f32 %v2834_v34, 0.0  ;;  %v2837_v57 = vadd.f32 %v5979_v44, %v2798_v14  ;;  %v2797_v13 = vmul.f32 %v5969_v58, %v2758_v19  ;;  %v2761_v59 = vadd.f32 %v4326_v26, %v2487_v53 }
 0x221   : > { %2899 = vst [vmem:[%s5998_s14 + $0xc8] sm:$0xff] %v2867_v20  ;;  %v2486_v30 = vadd.f32 %v2439_v23, %v2212_v35  ;;  %v2713_v45 = vpop.f32.mrf.mxu0  ;;  %v4249_v38 = vpop.f32.mrf.mxu1 }
 0x222   : > { %2898 = vst [vmem:[%s5998_s14 + $0xc0] sm:$0xff] %v2866_v47  ;;  %v2869_v9 = vmax.f32 %v2837_v57, 0.0  ;;  %v2836_v2 = vadd.f32 %v5979_v44, %v2797_v13  ;;  %v2800_v39 = vmul.f32 %v5969_v58, %v2761_v59  ;;  %v2489_v11 = vadd.f32 %v4249_v38, %v2215_v24 }
 0x223   : > { %v2760_v32 = vadd.f32 %v2713_v45, %v2486_v30  ;;  %v4329_v40 = vpop.f32.mrf.mxu0  ;;  %v2449_v29 = vpop.f32.mrf.mxu1 }
 0x224   : > { %2901 = vst [vmem:[%s5998_s14 + $0xd8] sm:$0xff] %v2869_v9  ;;  %v2868_v25 = vmax.f32 %v2836_v2, 0.0  ;;  %v2839_v16 = vadd.f32 %v5979_v44, %v2800_v39  ;;  %v2763_v56 = vadd.f32 %v4329_v40, %v2489_v11  ;;  %v2488_v61 = vadd.f32 %v2449_v29, %v2214_v46 }
 0x225   : > { %v2799_v7 = vmul.f32 %v5969_v58, %v2760_v32  ;;  %v2723_v5 = vpop.f32.mrf.mxu0 }
 0x226   : > { %2900 = vst [vmem:[%s5998_s14 + $0xd0] sm:$0xff] %v2868_v25  ;;  %v2871_v49 = vmax.f32 %v2839_v16, 0.0  ;;  %v2802_v55 = vmul.f32 %v5969_v58, %v2763_v56  ;;  %v2762_v4 = vadd.f32 %v2723_v5, %v2488_v61 }
 0x227   : > { %v2838_v42 = vadd.f32 %v5979_v44, %v2799_v7 }
 0x228   : > { %2903 = vst [vmem:[%s5998_s14 + $0xe8] sm:$0xff] %v2871_v49  ;;  %v2841_v37 = vadd.f32 %v5979_v44, %v2802_v55  ;;  %v2801_v63 = vmul.f32 %v5969_v58, %v2762_v4 }
 0x229   : > { %v2870_v27 = vmax.f32 %v2838_v42, 0.0 }
 0x22a   : > { %v2873_v1 = vmax.f32 %v2841_v37, 0.0  ;;  %v2840_v22 = vadd.f32 %v5979_v44, %v2801_v63 }
 0x22b   : > { %2902 = vst [vmem:[%s5998_s14 + $0xe0] sm:$0xff] %v2870_v27 }
 0x22c   : > { %2905 = vst [vmem:[%s5998_s14 + $0xf8] sm:$0xff] %v2873_v1  ;;  %v2872_v48 = vmax.f32 %v2840_v22, 0.0 }
 0x22e   : > { %2904 = vst [vmem:[%s5998_s14 + $0xf0] sm:$0xff] %v2872_v48 }
 0x22f   : > { %4433 = shalt.err (!%p4430_p5)
}
 0x230   : > { %s4434_s5 = scalar_lea.hbm %s6165_s29, 4096  ;;  %s4438_s11 = scalar_lea.hbm %s6222_s4, 8192 }
 0x231   : > { %p4435_p6 = scmp.ne.s32.totalorder %s6165_s29, %s4434_s5  ;;  %p4439_p10 = scmp.lt.s32.totalorder %s6165_s29, %s6222_s4 }
 0x232   : > { %p4440_p11 = scmp.lt.s32.totalorder %s4438_s11, %s4434_s5 }
 0x233   : > { %p4436_p7 = pnand %p4435_p6, %p4566_p4 }
 0x234   : > { %p4441_p12 = por %p4440_p11, %p4439_p10 }
 0x235   : > { %p4437_p9 = pneg %p4436_p7 }
 0x237   : > { %p4442_p13 = pnand %p4441_p12, %p4437_p9 }
 0x239   : > { %4445 = shalt.err (!%p4442_p13)
}
 0x23a   : > { %s4499_s14 = smov 128   ;;  %s4500_s21 = smov 8  }
 0x23b   : > { %4363 = dma.vmem_to_hbm [thread:$0]  (%p4566_p4), %s6167_s22, 4096, %s6165_s29, %s6173_s18, %s4499_s14, %s4499_s14, %s4500_s21  }
 0x23c PF: > { %p4369_p0 = scmp.ge.s32.totalorder %s4496_s20, 2  ;;  %s2936_s24 = sand.u32 1, %s4476_s15  }
 0x23d   : > { %s2937_s26 = scalar_lea.sflag [#allocation3], %s2936_s24 }
 0x23e   : > { %p4366_p1 = pnand %p4369_p0, %p4573_p8 }
 0x240   : > { %p4367_p2 = pneg %p4366_p1 }
 0x242   : > { %4471 = dma.done.wait (%p4367_p2), %s2937_s26, 4096  }
 0x243   : > { %4473 = vsyncadd (%p4367_p2), %s2937_s26, 4294963200  ;;  %s17_s20 = sadd.s32 1, %s4496_s20   ;;  %s6313_s15 = smov %s4480_s16 }
 0x244   : > { %p14_p3 = scmp.ge.s32.totalorder %s17_s20, 4   ;;  %s6314_s16 = smov %s4484_s17 }
 0x245   : > { %s6315_s17 = smov %s4579_s28  ;;  %s6316_s18 = smov %s4492_s19 }
 0x246   : > { %s6317_s19 = smov %s6319_s23  ;;  %16 = sbr.rel (!%p14_p3) target bundleno = 4 (0x4), region = 88 }
 0x24b   :  { %2942 = vsyncpa [#allocation3], 1 }
 0x24c   :  { %2944 = vsyncpa [#allocation3 + $0x1], 1 }

</bundles_post_ra>
